<compile_context>
chip_gen: v7x
topology: tpu7x:2x2x1
jax: 0.10.0
libtpu: 0.0.40
codegen_flags: <defaults>
</compile_context>

<pallas_src>
import functools

import jax
import jax.numpy as jnp
from jax.experimental import pallas as pl
from jax.experimental.pallas import tpu as pltpu


def _gates_to_hc(gates, c, H):
    """PyTorch LSTM gate order i, f, g, o. Full-width EUP pushes, slice afterwards."""
    sig = jax.nn.sigmoid(gates)   # one EUP pass over the full (B, 4H) tile
    th = jnp.tanh(gates)          # one EUP pass over the full (B, 4H) tile
    i = sig[:, 0 * H:1 * H]
    f = sig[:, 1 * H:2 * H]
    g = th[:, 2 * H:3 * H]
    o = sig[:, 3 * H:4 * H]
    c_new = f * c + i * g
    h_new = o * jnp.tanh(c_new)
    return h_new, c_new


def stacked_lstm_kernel(
    x_ref,            # (T*B, I)   VMEM, time-major rows: row t*B + b
    wih1_ref,         # (I, 4H)    VMEM (= W_ih1^T)
    whh1_ref,         # (H, 4H)    VMEM (= W_hh1^T)
    b1_ref,           # (1, 4H)    VMEM (= b_ih1 + b_hh1)
    wih2_ref,         # (H, 4H)    VMEM (= W_ih2^T)
    whh2_ref,         # (H, 4H)    VMEM (= W_hh2^T)
    b2_ref,           # (1, 4H)    VMEM (= b_ih2 + b_hh2)
    wfc1_hbm,         # (H, 512)   HBM (pl.ANY) — manually DMA'd
    bfc1_ref,         # (1, 512)   VMEM
    wfc2_hbm,         # (512, 128) HBM (pl.ANY) — manually DMA'd
    bfc2_ref,         # (1, 128)   VMEM
    wfc3_hbm,         # (128, O)   HBM (pl.ANY) — manually DMA'd
    bfc3_ref,         # (1, O)     VMEM
    out_ref,          # (B, O)
    wfc1_buf,         # VMEM scratch (H, 512)
    wfc2_buf,         # VMEM scratch (512, 128)
    wfc3_buf,         # VMEM scratch (128, O)
    dma_sem,          # DMA semaphores (3,)
    *,
    seq_len: int,
    batch: int,
    hidden_size: int,
):
    T = seq_len
    B = batch
    H = hidden_size

    # ---- Kick off FC-head weight DMAs; they hide behind the recurrence -------
    cp1 = pltpu.make_async_copy(wfc1_hbm, wfc1_buf, dma_sem.at[0])
    cp2 = pltpu.make_async_copy(wfc2_hbm, wfc2_buf, dma_sem.at[1])
    cp3 = pltpu.make_async_copy(wfc3_hbm, wfc3_buf, dma_sem.at[2])
    cp1.start()
    cp2.start()
    cp3.start()

    # ---- Hoisted, non-recurrent work -----------------------------------------
    # Layer-1 input projection for ALL timesteps in one lane-dense matmul,
    # with b1 folded in (added exactly once).
    xw1 = (
        jnp.dot(x_ref[...], wih1_ref[...], preferred_element_type=jnp.float32)
        + b1_ref[...]
    )  # (T*B, 4H)

    whh1 = whh1_ref[...]                                    # (H, 4H)
    wih2 = wih2_ref[...]                                    # (H, 4H)
    whh2 = whh2_ref[...]                                    # (H, 4H)
    b2_b = jnp.broadcast_to(b2_ref[...], (B, 4 * H))        # broadcast once, reused

    # ---- Serial recurrence (fully unrolled, T is static) ---------------------
    h1 = jnp.zeros((B, H), jnp.float32)
    c1 = jnp.zeros((B, H), jnp.float32)
    h2 = jnp.zeros((B, H), jnp.float32)
    c2 = jnp.zeros((B, H), jnp.float32)

    for t in range(T):
        # Layer-2 recurrent term depends only on PREVIOUS step's h2, so it can be
        # issued in parallel with layer-1's recurrent dot + activations.
        d2r = jnp.dot(h2, whh2, preferred_element_type=jnp.float32)

        # LSTM layer 1: only the recurrent matmul is on the critical path.
        gates1 = xw1[t * B:(t + 1) * B, :] + jnp.dot(
            h1, whh1, preferred_element_type=jnp.float32
        )
        h1, c1 = _gates_to_hc(gates1, c1, H)

        # Dropout(eval) == identity; LSTM layer 2 input projection on the new h1.
        gates2 = jnp.dot(h1, wih2, preferred_element_type=jnp.float32) + d2r + b2_b
        h2, c2 = _gates_to_hc(gates2, c2, H)

    # ---- FC head on the last timestep output of LSTM2 (h2 == out[:, -1, :]) --
    cp1.wait()
    cp2.wait()
    cp3.wait()
    y = jnp.dot(h2, wfc1_buf[...], preferred_element_type=jnp.float32) + bfc1_ref[...]
    y = jnp.maximum(y, 0.0)
    y = jnp.dot(y, wfc2_buf[...], preferred_element_type=jnp.float32) + bfc2_ref[...]
    y = jnp.maximum(y, 0.0)
    y = jnp.dot(y, wfc3_buf[...], preferred_element_type=jnp.float32) + bfc3_ref[...]
    out_ref[...] = y.astype(out_ref.dtype)


def stacked_lstm_forward(x, params, hidden_size, output_size):
    """x: (B, T, I) float32 (batch_first, like the PyTorch module)."""
    B, T, I = x.shape
    # B must be a multiple of 8 so the per-step xw1 slice is a clean sublane slice.
    assert B % 8 == 0, "batch must be a multiple of 8 (TPU sublane width)"
    # time-major rows: (T, B, I) -> (T*B, I) so the kernel does ONE input projection.
    x_rows = jnp.transpose(x, (1, 0, 2)).reshape(T * B, I)

    kernel = functools.partial(
        stacked_lstm_kernel, seq_len=T, batch=B, hidden_size=hidden_size
    )

    vmem = pl.BlockSpec(memory_space=pltpu.MemorySpace.VMEM)
    hbm = pl.BlockSpec(memory_space=pl.ANY)

    out = pl.pallas_call(
        kernel,
        out_shape=jax.ShapeDtypeStruct((B, output_size), jnp.float32),
        # No grid: a single invocation; small operands are whole-array VMEM blocks,
        # FC-head weights stay in HBM and are streamed manually inside the kernel.
        in_specs=[
            vmem,  # x_rows
            vmem, vmem, vmem,   # wih1_t, whh1_t, b1
            vmem, vmem, vmem,   # wih2_t, whh2_t, b2
            hbm, vmem,          # wfc1_t (HBM), bfc1
            hbm, vmem,          # wfc2_t (HBM), bfc2
            hbm, vmem,          # wfc3_t (HBM), bfc3
        ],
        scratch_shapes=[
            pltpu.VMEM((hidden_size, 512), jnp.float32),
            pltpu.VMEM((512, 128), jnp.float32),
            pltpu.VMEM((128, output_size), jnp.float32),
            pltpu.SemaphoreType.DMA((3,)),
        ],
    )(
        x_rows,
        params["wih1_t"], params["whh1_t"], params["b1"],
        params["wih2_t"], params["whh2_t"], params["b2"],
        params["wfc1_t"], params["bfc1"],
        params["wfc2_t"], params["bfc2"],
        params["wfc3_t"], params["bfc3"],
    )
    return out


def init_params(key, input_size, hidden_size, output_size):
    """Deterministic synthetic parameter init (PyTorch-style uniform ranges)."""
    ks = jax.random.split(key, 16)
    H = hidden_size
    k_lstm = 1.0 / jnp.sqrt(H)

    def u(k, shape, bound):
        return jax.random.uniform(k, shape, jnp.float32, -bound, bound)

    # LSTM1: W_ih (4H, I), W_hh (4H, H), b_ih (4H), b_hh (4H)
    w_ih1 = u(ks[0], (4 * H, input_size), k_lstm)
    w_hh1 = u(ks[1], (4 * H, H), k_lstm)
    b_ih1 = u(ks[2], (4 * H,), k_lstm)
    b_hh1 = u(ks[3], (4 * H,), k_lstm)
    # LSTM2: input is hidden_size
    w_ih2 = u(ks[4], (4 * H, H), k_lstm)
    w_hh2 = u(ks[5], (4 * H, H), k_lstm)
    b_ih2 = u(ks[6], (4 * H,), k_lstm)
    b_hh2 = u(ks[7], (4 * H,), k_lstm)
    # FC layers
    k1 = 1.0 / jnp.sqrt(H)
    w_fc1 = u(ks[8], (512, H), k1)
    b_fc1 = u(ks[9], (512,), k1)
    k2 = 1.0 / jnp.sqrt(512.0)
    w_fc2 = u(ks[10], (128, 512), k2)
    b_fc2 = u(ks[11], (128,), k2)
    k3 = 1.0 / jnp.sqrt(128.0)
    w_fc3 = u(ks[12], (output_size, 128), k3)
    b_fc3 = u(ks[13], (output_size,), k3)

    # Pre-transpose / fuse biases for the kernel (layer-2 weights kept separate
    # so the h2-recurrent dot leaves the critical path inside the kernel).
    params = dict(
        wih1_t=w_ih1.T,                               # (I, 4H)
        whh1_t=w_hh1.T,                               # (H, 4H)
        b1=(b_ih1 + b_hh1)[None, :],                  # (1, 4H)
        wih2_t=w_ih2.T,                               # (H, 4H)
        whh2_t=w_hh2.T,                               # (H, 4H)
        b2=(b_ih2 + b_hh2)[None, :],                  # (1, 4H)
        wfc1_t=w_fc1.T, bfc1=b_fc1[None, :],
        wfc2_t=w_fc2.T, bfc2=b_fc2[None, :],
        wfc3_t=w_fc3.T, bfc3=b_fc3[None, :],
    )
    raw = dict(w_ih1=w_ih1, w_hh1=w_hh1, b_ih1=b_ih1, b_hh1=b_hh1,
               w_ih2=w_ih2, w_hh2=w_hh2, b_ih2=b_ih2, b_hh2=b_hh2,
               w_fc1=w_fc1, b_fc1=b_fc1, w_fc2=w_fc2, b_fc2=b_fc2,
               w_fc3=w_fc3, b_fc3=b_fc3)
    return params, raw


def reference_forward(x, raw, hidden_size):
    """Pure-JAX reference mirroring the PyTorch forward (eval mode)."""
    B, T, I = x.shape
    H = hidden_size

    def cell(x_t, h, c, w_ih, w_hh, b_ih, b_hh):
        g = x_t @ w_ih.T + h @ w_hh.T + b_ih + b_hh
        i = jax.nn.sigmoid(g[:, :H])
        f = jax.nn.sigmoid(g[:, H:2 * H])
        gg = jnp.tanh(g[:, 2 * H:3 * H])
        o = jax.nn.sigmoid(g[:, 3 * H:])
        c = f * c + i * gg
        h = o * jnp.tanh(c)
        return h, c

    h1 = c1 = h2 = c2 = jnp.zeros((B, H), jnp.float32)
    for t in range(T):
        h1, c1 = cell(x[:, t, :], h1, c1, raw["w_ih1"], raw["w_hh1"],
                      raw["b_ih1"], raw["b_hh1"])
        h2, c2 = cell(h1, h2, c2, raw["w_ih2"], raw["w_hh2"],
                      raw["b_ih2"], raw["b_hh2"])
    y = jnp.maximum(h2 @ raw["w_fc1"].T + raw["b_fc1"], 0.0)
    y = jnp.maximum(y @ raw["w_fc2"].T + raw["b_fc2"], 0.0)
    y = y @ raw["w_fc3"].T + raw["b_fc3"]
    return y


if __name__ == "__main__":
    # Small shapes consistent with the module's forward: (batch, seq, input_size)
    batch, seq_len, input_size = 8, 8, 8
    hidden_size, output_size = 32, 4

    key = jax.random.PRNGKey(0)
    kx, kp = jax.random.split(key)
    x = jax.random.normal(kx, (batch, seq_len, input_size), jnp.float32)

    params, raw = init_params(kp, input_size, hidden_size, output_size)

    out = stacked_lstm_forward(x, params, hidden_size, output_size)
    out = jax.block_until_ready(out)

    ref = reference_forward(x, raw, hidden_size)
    assert out.shape == (batch, output_size)
    # Default-precision MXU matmuls (bf16-truncated inputs) in both kernel and
    # reference; slightly relaxed tolerance vs strict 1e-4 to absorb reassociation.
    assert jnp.allclose(out, ref, atol=5e-4, rtol=5e-4), (
        f"max abs err {jnp.max(jnp.abs(out - ref))}")

    print("KERNEL_OK")
</pallas_src>

<mosaic_0001>
module attributes {stable_mosaic.version = 11 : i64} {
  func.func @stacked_lstm_kernel(%arg0: memref<64x8xf32, #tpu.memory_space<vmem>>, %arg1: memref<8x128xf32, #tpu.memory_space<vmem>>, %arg2: memref<32x128xf32, #tpu.memory_space<vmem>>, %arg3: memref<1x128xf32, #tpu.memory_space<vmem>>, %arg4: memref<32x128xf32, #tpu.memory_space<vmem>>, %arg5: memref<32x128xf32, #tpu.memory_space<vmem>>, %arg6: memref<1x128xf32, #tpu.memory_space<vmem>>, %arg7: memref<32x512xf32, #tpu.memory_space<any>>, %arg8: memref<1x512xf32, #tpu.memory_space<vmem>>, %arg9: memref<512x128xf32, #tpu.memory_space<any>>, %arg10: memref<1x128xf32, #tpu.memory_space<vmem>>, %arg11: memref<128x4xf32, #tpu.memory_space<any>>, %arg12: memref<1x4xf32, #tpu.memory_space<vmem>>, %arg13: memref<8x4xf32, #tpu.memory_space<vmem>>, %arg14: memref<32x512xf32, #tpu.memory_space<vmem>>, %arg15: memref<512x128xf32, #tpu.memory_space<vmem>>, %arg16: memref<128x4xf32, #tpu.memory_space<vmem>>, %arg17: memref<3x!tpu.dma_semaphore, #tpu.memory_space<semaphore_mem>>) attributes {dimension_semantics = [], scalar_prefetch = 0 : i64, scratch_operands = 4 : i64, tpu.core_type = #tpu.core_type<tc>} {
    %c0_i32 = arith.constant 0 : i32
    %0 = tpu.memref_slice %arg17[%c0_i32] : memref<3x!tpu.dma_semaphore, #tpu.memory_space<semaphore_mem>> -> memref<1x!tpu.dma_semaphore, #tpu.memory_space<semaphore_mem>>
    %1 = tpu.memref_squeeze %0 : memref<1x!tpu.dma_semaphore, #tpu.memory_space<semaphore_mem>> -> memref<!tpu.dma_semaphore, #tpu.memory_space<semaphore_mem>>
    tpu.enqueue_dma source(%arg7 : memref<32x512xf32, #tpu.memory_space<any>>) target(%arg14 : memref<32x512xf32, #tpu.memory_space<vmem>>) target_semaphore(%1 : memref<!tpu.dma_semaphore, #tpu.memory_space<semaphore_mem>>)
    %c1_i32 = arith.constant 1 : i32
    %2 = tpu.memref_slice %arg17[%c1_i32] : memref<3x!tpu.dma_semaphore, #tpu.memory_space<semaphore_mem>> -> memref<1x!tpu.dma_semaphore, #tpu.memory_space<semaphore_mem>>
    %3 = tpu.memref_squeeze %2 : memref<1x!tpu.dma_semaphore, #tpu.memory_space<semaphore_mem>> -> memref<!tpu.dma_semaphore, #tpu.memory_space<semaphore_mem>>
    tpu.enqueue_dma source(%arg9 : memref<512x128xf32, #tpu.memory_space<any>>) target(%arg15 : memref<512x128xf32, #tpu.memory_space<vmem>>) target_semaphore(%3 : memref<!tpu.dma_semaphore, #tpu.memory_space<semaphore_mem>>)
    %c2_i32 = arith.constant 2 : i32
    %4 = tpu.memref_slice %arg17[%c2_i32] : memref<3x!tpu.dma_semaphore, #tpu.memory_space<semaphore_mem>> -> memref<1x!tpu.dma_semaphore, #tpu.memory_space<semaphore_mem>>
    %5 = tpu.memref_squeeze %4 : memref<1x!tpu.dma_semaphore, #tpu.memory_space<semaphore_mem>> -> memref<!tpu.dma_semaphore, #tpu.memory_space<semaphore_mem>>
    tpu.enqueue_dma source(%arg11 : memref<128x4xf32, #tpu.memory_space<any>>) target(%arg16 : memref<128x4xf32, #tpu.memory_space<vmem>>) target_semaphore(%5 : memref<!tpu.dma_semaphore, #tpu.memory_space<semaphore_mem>>)
    %c0 = arith.constant 0 : index
    %c0_0 = arith.constant 0 : index
    %6 = vector.load %arg0[%c0, %c0_0] : memref<64x8xf32, #tpu.memory_space<vmem>>, vector<64x8xf32>
    %c0_1 = arith.constant 0 : index
    %c0_2 = arith.constant 0 : index
    %7 = vector.load %arg1[%c0_1, %c0_2] : memref<8x128xf32, #tpu.memory_space<vmem>>, vector<8x128xf32>
    %cst = arith.constant dense<0.000000e+00> : vector<64x128xf32>
    %8 = tpu.matmul %6, %7, %cst {dimension_numbers = #tpu.dot_dimension_numbers<[1], [0], [0], [1], [0, 0, 1, 1], [], []>} : vector<64x8xf32>, vector<8x128xf32>, vector<64x128xf32> -> vector<64x128xf32>
    %c0_3 = arith.constant 0 : index
    %c0_4 = arith.constant 0 : index
    %9 = vector.load %arg3[%c0_3, %c0_4] : memref<1x128xf32, #tpu.memory_space<vmem>>, vector<1x128xf32>
    %10 = vector.broadcast %9 : vector<1x128xf32> to vector<64x128xf32>
    %11 = arith.addf %8, %10 : vector<64x128xf32>
    %c0_5 = arith.constant 0 : index
    %c0_6 = arith.constant 0 : index
    %12 = vector.load %arg2[%c0_5, %c0_6] : memref<32x128xf32, #tpu.memory_space<vmem>>, vector<32x128xf32>
    %c0_7 = arith.constant 0 : index
    %c0_8 = arith.constant 0 : index
    %13 = vector.load %arg4[%c0_7, %c0_8] : memref<32x128xf32, #tpu.memory_space<vmem>>, vector<32x128xf32>
    %c0_9 = arith.constant 0 : index
    %c0_10 = arith.constant 0 : index
    %14 = vector.load %arg5[%c0_9, %c0_10] : memref<32x128xf32, #tpu.memory_space<vmem>>, vector<32x128xf32>
    %c0_11 = arith.constant 0 : index
    %c0_12 = arith.constant 0 : index
    %15 = vector.load %arg6[%c0_11, %c0_12] : memref<1x128xf32, #tpu.memory_space<vmem>>, vector<1x128xf32>
    %16 = vector.shape_cast %15 : vector<1x128xf32> to vector<1x128xf32>
    %17 = vector.broadcast %16 : vector<1x128xf32> to vector<8x128xf32>
    %cst_13 = arith.constant 0.000000e+00 : f32
    %18 = vector.broadcast %cst_13 : f32 to vector<8x32xf32>
    %cst_14 = arith.constant 0.000000e+00 : f32
    %19 = vector.broadcast %cst_14 : f32 to vector<8x32xf32>
    %cst_15 = arith.constant 0.000000e+00 : f32
    %20 = vector.broadcast %cst_15 : f32 to vector<8x32xf32>
    %cst_16 = arith.constant 0.000000e+00 : f32
    %21 = vector.broadcast %cst_16 : f32 to vector<8x32xf32>
    %cst_17 = arith.constant dense<0.000000e+00> : vector<8x128xf32>
    %22 = tpu.matmul %20, %14, %cst_17 {dimension_numbers = #tpu.dot_dimension_numbers<[1], [0], [0], [1], [0, 0, 1, 1], [], []>} : vector<8x32xf32>, vector<32x128xf32>, vector<8x128xf32> -> vector<8x128xf32>
    %23 = vector.extract_strided_slice %11 {offsets = [0, 0], sizes = [8, 128], strides = [1, 1]} : vector<64x128xf32> to vector<8x128xf32>
    %cst_18 = arith.constant dense<0.000000e+00> : vector<8x128xf32>
    %24 = tpu.matmul %18, %12, %cst_18 {dimension_numbers = #tpu.dot_dimension_numbers<[1], [0], [0], [1], [0, 0, 1, 1], [], []>} : vector<8x32xf32>, vector<32x128xf32>, vector<8x128xf32> -> vector<8x128xf32>
    %25 = arith.addf %23, %24 : vector<8x128xf32>
    %26 = arith.negf %25 : vector<8x128xf32>
    %27 = math.exp %26 : vector<8x128xf32>
    %cst_19 = arith.constant 1.000000e+00 : f32
    %28 = vector.broadcast %cst_19 : f32 to vector<8x128xf32>
    %29 = arith.addf %28, %27 : vector<8x128xf32>
    %30 = arith.divf %28, %29 : vector<8x128xf32>
    %31 = math.tanh %25 : vector<8x128xf32>
    %32 = vector.extract_strided_slice %30 {offsets = [0, 0], sizes = [8, 32], strides = [1, 1]} : vector<8x128xf32> to vector<8x32xf32>
    %33 = vector.extract_strided_slice %30 {offsets = [0, 32], sizes = [8, 32], strides = [1, 1]} : vector<8x128xf32> to vector<8x32xf32>
    %34 = vector.extract_strided_slice %31 {offsets = [0, 64], sizes = [8, 32], strides = [1, 1]} : vector<8x128xf32> to vector<8x32xf32>
    %35 = vector.extract_strided_slice %30 {offsets = [0, 96], sizes = [8, 32], strides = [1, 1]} : vector<8x128xf32> to vector<8x32xf32>
    %36 = arith.mulf %33, %19 : vector<8x32xf32>
    %37 = arith.mulf %32, %34 : vector<8x32xf32>
    %38 = arith.addf %36, %37 : vector<8x32xf32>
    %39 = math.tanh %38 : vector<8x32xf32>
    %40 = arith.mulf %35, %39 : vector<8x32xf32>
    %cst_20 = arith.constant dense<0.000000e+00> : vector<8x128xf32>
    %41 = tpu.matmul %40, %13, %cst_20 {dimension_numbers = #tpu.dot_dimension_numbers<[1], [0], [0], [1], [0, 0, 1, 1], [], []>} : vector<8x32xf32>, vector<32x128xf32>, vector<8x128xf32> -> vector<8x128xf32>
    %42 = arith.addf %41, %22 : vector<8x128xf32>
    %43 = arith.addf %42, %17 : vector<8x128xf32>
    %44 = arith.negf %43 : vector<8x128xf32>
    %45 = math.exp %44 : vector<8x128xf32>
    %cst_21 = arith.constant 1.000000e+00 : f32
    %46 = vector.broadcast %cst_21 : f32 to vector<8x128xf32>
    %47 = arith.addf %46, %45 : vector<8x128xf32>
    %48 = arith.divf %46, %47 : vector<8x128xf32>
    %49 = math.tanh %43 : vector<8x128xf32>
    %50 = vector.extract_strided_slice %48 {offsets = [0, 0], sizes = [8, 32], strides = [1, 1]} : vector<8x128xf32> to vector<8x32xf32>
    %51 = vector.extract_strided_slice %48 {offsets = [0, 32], sizes = [8, 32], strides = [1, 1]} : vector<8x128xf32> to vector<8x32xf32>
    %52 = vector.extract_strided_slice %49 {offsets = [0, 64], sizes = [8, 32], strides = [1, 1]} : vector<8x128xf32> to vector<8x32xf32>
    %53 = vector.extract_strided_slice %48 {offsets = [0, 96], sizes = [8, 32], strides = [1, 1]} : vector<8x128xf32> to vector<8x32xf32>
    %54 = arith.mulf %51, %21 : vector<8x32xf32>
    %55 = arith.mulf %50, %52 : vector<8x32xf32>
    %56 = arith.addf %54, %55 : vector<8x32xf32>
    %57 = math.tanh %56 : vector<8x32xf32>
    %58 = arith.mulf %53, %57 : vector<8x32xf32>
    %cst_22 = arith.constant dense<0.000000e+00> : vector<8x128xf32>
    %59 = tpu.matmul %58, %14, %cst_22 {dimension_numbers = #tpu.dot_dimension_numbers<[1], [0], [0], [1], [0, 0, 1, 1], [], []>} : vector<8x32xf32>, vector<32x128xf32>, vector<8x128xf32> -> vector<8x128xf32>
    %60 = vector.extract_strided_slice %11 {offsets = [8, 0], sizes = [8, 128], strides = [1, 1]} : vector<64x128xf32> to vector<8x128xf32>
    %cst_23 = arith.constant dense<0.000000e+00> : vector<8x128xf32>
    %61 = tpu.matmul %40, %12, %cst_23 {dimension_numbers = #tpu.dot_dimension_numbers<[1], [0], [0], [1], [0, 0, 1, 1], [], []>} : vector<8x32xf32>, vector<32x128xf32>, vector<8x128xf32> -> vector<8x128xf32>
    %62 = arith.addf %60, %61 : vector<8x128xf32>
    %63 = arith.negf %62 : vector<8x128xf32>
    %64 = math.exp %63 : vector<8x128xf32>
    %cst_24 = arith.constant 1.000000e+00 : f32
    %65 = vector.broadcast %cst_24 : f32 to vector<8x128xf32>
    %66 = arith.addf %65, %64 : vector<8x128xf32>
    %67 = arith.divf %65, %66 : vector<8x128xf32>
    %68 = math.tanh %62 : vector<8x128xf32>
    %69 = vector.extract_strided_slice %67 {offsets = [0, 0], sizes = [8, 32], strides = [1, 1]} : vector<8x128xf32> to vector<8x32xf32>
    %70 = vector.extract_strided_slice %67 {offsets = [0, 32], sizes = [8, 32], strides = [1, 1]} : vector<8x128xf32> to vector<8x32xf32>
    %71 = vector.extract_strided_slice %68 {offsets = [0, 64], sizes = [8, 32], strides = [1, 1]} : vector<8x128xf32> to vector<8x32xf32>
    %72 = vector.extract_strided_slice %67 {offsets = [0, 96], sizes = [8, 32], strides = [1, 1]} : vector<8x128xf32> to vector<8x32xf32>
    %73 = arith.mulf %70, %38 : vector<8x32xf32>
    %74 = arith.mulf %69, %71 : vector<8x32xf32>
    %75 = arith.addf %73, %74 : vector<8x32xf32>
    %76 = math.tanh %75 : vector<8x32xf32>
    %77 = arith.mulf %72, %76 : vector<8x32xf32>
    %cst_25 = arith.constant dense<0.000000e+00> : vector<8x128xf32>
    %78 = tpu.matmul %77, %13, %cst_25 {dimension_numbers = #tpu.dot_dimension_numbers<[1], [0], [0], [1], [0, 0, 1, 1], [], []>} : vector<8x32xf32>, vector<32x128xf32>, vector<8x128xf32> -> vector<8x128xf32>
    %79 = arith.addf %78, %59 : vector<8x128xf32>
    %80 = arith.addf %79, %17 : vector<8x128xf32>
    %81 = arith.negf %80 : vector<8x128xf32>
    %82 = math.exp %81 : vector<8x128xf32>
    %cst_26 = arith.constant 1.000000e+00 : f32
    %83 = vector.broadcast %cst_26 : f32 to vector<8x128xf32>
    %84 = arith.addf %83, %82 : vector<8x128xf32>
    %85 = arith.divf %83, %84 : vector<8x128xf32>
    %86 = math.tanh %80 : vector<8x128xf32>
    %87 = vector.extract_strided_slice %85 {offsets = [0, 0], sizes = [8, 32], strides = [1, 1]} : vector<8x128xf32> to vector<8x32xf32>
    %88 = vector.extract_strided_slice %85 {offsets = [0, 32], sizes = [8, 32], strides = [1, 1]} : vector<8x128xf32> to vector<8x32xf32>
    %89 = vector.extract_strided_slice %86 {offsets = [0, 64], sizes = [8, 32], strides = [1, 1]} : vector<8x128xf32> to vector<8x32xf32>
    %90 = vector.extract_strided_slice %85 {offsets = [0, 96], sizes = [8, 32], strides = [1, 1]} : vector<8x128xf32> to vector<8x32xf32>
    %91 = arith.mulf %88, %56 : vector<8x32xf32>
    %92 = arith.mulf %87, %89 : vector<8x32xf32>
    %93 = arith.addf %91, %92 : vector<8x32xf32>
    %94 = math.tanh %93 : vector<8x32xf32>
    %95 = arith.mulf %90, %94 : vector<8x32xf32>
    %cst_27 = arith.constant dense<0.000000e+00> : vector<8x128xf32>
    %96 = tpu.matmul %95, %14, %cst_27 {dimension_numbers = #tpu.dot_dimension_numbers<[1], [0], [0], [1], [0, 0, 1, 1], [], []>} : vector<8x32xf32>, vector<32x128xf32>, vector<8x128xf32> -> vector<8x128xf32>
    %97 = vector.extract_strided_slice %11 {offsets = [16, 0], sizes = [8, 128], strides = [1, 1]} : vector<64x128xf32> to vector<8x128xf32>
    %cst_28 = arith.constant dense<0.000000e+00> : vector<8x128xf32>
    %98 = tpu.matmul %77, %12, %cst_28 {dimension_numbers = #tpu.dot_dimension_numbers<[1], [0], [0], [1], [0, 0, 1, 1], [], []>} : vector<8x32xf32>, vector<32x128xf32>, vector<8x128xf32> -> vector<8x128xf32>
    %99 = arith.addf %97, %98 : vector<8x128xf32>
    %100 = arith.negf %99 : vector<8x128xf32>
    %101 = math.exp %100 : vector<8x128xf32>
    %cst_29 = arith.constant 1.000000e+00 : f32
    %102 = vector.broadcast %cst_29 : f32 to vector<8x128xf32>
    %103 = arith.addf %102, %101 : vector<8x128xf32>
    %104 = arith.divf %102, %103 : vector<8x128xf32>
    %105 = math.tanh %99 : vector<8x128xf32>
    %106 = vector.extract_strided_slice %104 {offsets = [0, 0], sizes = [8, 32], strides = [1, 1]} : vector<8x128xf32> to vector<8x32xf32>
    %107 = vector.extract_strided_slice %104 {offsets = [0, 32], sizes = [8, 32], strides = [1, 1]} : vector<8x128xf32> to vector<8x32xf32>
    %108 = vector.extract_strided_slice %105 {offsets = [0, 64], sizes = [8, 32], strides = [1, 1]} : vector<8x128xf32> to vector<8x32xf32>
    %109 = vector.extract_strided_slice %104 {offsets = [0, 96], sizes = [8, 32], strides = [1, 1]} : vector<8x128xf32> to vector<8x32xf32>
    %110 = arith.mulf %107, %75 : vector<8x32xf32>
    %111 = arith.mulf %106, %108 : vector<8x32xf32>
    %112 = arith.addf %110, %111 : vector<8x32xf32>
    %113 = math.tanh %112 : vector<8x32xf32>
    %114 = arith.mulf %109, %113 : vector<8x32xf32>
    %cst_30 = arith.constant dense<0.000000e+00> : vector<8x128xf32>
    %115 = tpu.matmul %114, %13, %cst_30 {dimension_numbers = #tpu.dot_dimension_numbers<[1], [0], [0], [1], [0, 0, 1, 1], [], []>} : vector<8x32xf32>, vector<32x128xf32>, vector<8x128xf32> -> vector<8x128xf32>
    %116 = arith.addf %115, %96 : vector<8x128xf32>
    %117 = arith.addf %116, %17 : vector<8x128xf32>
    %118 = arith.negf %117 : vector<8x128xf32>
    %119 = math.exp %118 : vector<8x128xf32>
    %cst_31 = arith.constant 1.000000e+00 : f32
    %120 = vector.broadcast %cst_31 : f32 to vector<8x128xf32>
    %121 = arith.addf %120, %119 : vector<8x128xf32>
    %122 = arith.divf %120, %121 : vector<8x128xf32>
    %123 = math.tanh %117 : vector<8x128xf32>
    %124 = vector.extract_strided_slice %122 {offsets = [0, 0], sizes = [8, 32], strides = [1, 1]} : vector<8x128xf32> to vector<8x32xf32>
    %125 = vector.extract_strided_slice %122 {offsets = [0, 32], sizes = [8, 32], strides = [1, 1]} : vector<8x128xf32> to vector<8x32xf32>
    %126 = vector.extract_strided_slice %123 {offsets = [0, 64], sizes = [8, 32], strides = [1, 1]} : vector<8x128xf32> to vector<8x32xf32>
    %127 = vector.extract_strided_slice %122 {offsets = [0, 96], sizes = [8, 32], strides = [1, 1]} : vector<8x128xf32> to vector<8x32xf32>
    %128 = arith.mulf %125, %93 : vector<8x32xf32>
    %129 = arith.mulf %124, %126 : vector<8x32xf32>
    %130 = arith.addf %128, %129 : vector<8x32xf32>
    %131 = math.tanh %130 : vector<8x32xf32>
    %132 = arith.mulf %127, %131 : vector<8x32xf32>
    %cst_32 = arith.constant dense<0.000000e+00> : vector<8x128xf32>
    %133 = tpu.matmul %132, %14, %cst_32 {dimension_numbers = #tpu.dot_dimension_numbers<[1], [0], [0], [1], [0, 0, 1, 1], [], []>} : vector<8x32xf32>, vector<32x128xf32>, vector<8x128xf32> -> vector<8x128xf32>
    %134 = vector.extract_strided_slice %11 {offsets = [24, 0], sizes = [8, 128], strides = [1, 1]} : vector<64x128xf32> to vector<8x128xf32>
    %cst_33 = arith.constant dense<0.000000e+00> : vector<8x128xf32>
    %135 = tpu.matmul %114, %12, %cst_33 {dimension_numbers = #tpu.dot_dimension_numbers<[1], [0], [0], [1], [0, 0, 1, 1], [], []>} : vector<8x32xf32>, vector<32x128xf32>, vector<8x128xf32> -> vector<8x128xf32>
    %136 = arith.addf %134, %135 : vector<8x128xf32>
    %137 = arith.negf %136 : vector<8x128xf32>
    %138 = math.exp %137 : vector<8x128xf32>
    %cst_34 = arith.constant 1.000000e+00 : f32
    %139 = vector.broadcast %cst_34 : f32 to vector<8x128xf32>
    %140 = arith.addf %139, %138 : vector<8x128xf32>
    %141 = arith.divf %139, %140 : vector<8x128xf32>
    %142 = math.tanh %136 : vector<8x128xf32>
    %143 = vector.extract_strided_slice %141 {offsets = [0, 0], sizes = [8, 32], strides = [1, 1]} : vector<8x128xf32> to vector<8x32xf32>
    %144 = vector.extract_strided_slice %141 {offsets = [0, 32], sizes = [8, 32], strides = [1, 1]} : vector<8x128xf32> to vector<8x32xf32>
    %145 = vector.extract_strided_slice %142 {offsets = [0, 64], sizes = [8, 32], strides = [1, 1]} : vector<8x128xf32> to vector<8x32xf32>
    %146 = vector.extract_strided_slice %141 {offsets = [0, 96], sizes = [8, 32], strides = [1, 1]} : vector<8x128xf32> to vector<8x32xf32>
    %147 = arith.mulf %144, %112 : vector<8x32xf32>
    %148 = arith.mulf %143, %145 : vector<8x32xf32>
    %149 = arith.addf %147, %148 : vector<8x32xf32>
    %150 = math.tanh %149 : vector<8x32xf32>
    %151 = arith.mulf %146, %150 : vector<8x32xf32>
    %cst_35 = arith.constant dense<0.000000e+00> : vector<8x128xf32>
    %152 = tpu.matmul %151, %13, %cst_35 {dimension_numbers = #tpu.dot_dimension_numbers<[1], [0], [0], [1], [0, 0, 1, 1], [], []>} : vector<8x32xf32>, vector<32x128xf32>, vector<8x128xf32> -> vector<8x128xf32>
    %153 = arith.addf %152, %133 : vector<8x128xf32>
    %154 = arith.addf %153, %17 : vector<8x128xf32>
    %155 = arith.negf %154 : vector<8x128xf32>
    %156 = math.exp %155 : vector<8x128xf32>
    %cst_36 = arith.constant 1.000000e+00 : f32
    %157 = vector.broadcast %cst_36 : f32 to vector<8x128xf32>
    %158 = arith.addf %157, %156 : vector<8x128xf32>
    %159 = arith.divf %157, %158 : vector<8x128xf32>
    %160 = math.tanh %154 : vector<8x128xf32>
    %161 = vector.extract_strided_slice %159 {offsets = [0, 0], sizes = [8, 32], strides = [1, 1]} : vector<8x128xf32> to vector<8x32xf32>
    %162 = vector.extract_strided_slice %159 {offsets = [0, 32], sizes = [8, 32], strides = [1, 1]} : vector<8x128xf32> to vector<8x32xf32>
    %163 = vector.extract_strided_slice %160 {offsets = [0, 64], sizes = [8, 32], strides = [1, 1]} : vector<8x128xf32> to vector<8x32xf32>
    %164 = vector.extract_strided_slice %159 {offsets = [0, 96], sizes = [8, 32], strides = [1, 1]} : vector<8x128xf32> to vector<8x32xf32>
    %165 = arith.mulf %162, %130 : vector<8x32xf32>
    %166 = arith.mulf %161, %163 : vector<8x32xf32>
    %167 = arith.addf %165, %166 : vector<8x32xf32>
    %168 = math.tanh %167 : vector<8x32xf32>
    %169 = arith.mulf %164, %168 : vector<8x32xf32>
    %cst_37 = arith.constant dense<0.000000e+00> : vector<8x128xf32>
    %170 = tpu.matmul %169, %14, %cst_37 {dimension_numbers = #tpu.dot_dimension_numbers<[1], [0], [0], [1], [0, 0, 1, 1], [], []>} : vector<8x32xf32>, vector<32x128xf32>, vector<8x128xf32> -> vector<8x128xf32>
    %171 = vector.extract_strided_slice %11 {offsets = [32, 0], sizes = [8, 128], strides = [1, 1]} : vector<64x128xf32> to vector<8x128xf32>
    %cst_38 = arith.constant dense<0.000000e+00> : vector<8x128xf32>
    %172 = tpu.matmul %151, %12, %cst_38 {dimension_numbers = #tpu.dot_dimension_numbers<[1], [0], [0], [1], [0, 0, 1, 1], [], []>} : vector<8x32xf32>, vector<32x128xf32>, vector<8x128xf32> -> vector<8x128xf32>
    %173 = arith.addf %171, %172 : vector<8x128xf32>
    %174 = arith.negf %173 : vector<8x128xf32>
    %175 = math.exp %174 : vector<8x128xf32>
    %cst_39 = arith.constant 1.000000e+00 : f32
    %176 = vector.broadcast %cst_39 : f32 to vector<8x128xf32>
    %177 = arith.addf %176, %175 : vector<8x128xf32>
    %178 = arith.divf %176, %177 : vector<8x128xf32>
    %179 = math.tanh %173 : vector<8x128xf32>
    %180 = vector.extract_strided_slice %178 {offsets = [0, 0], sizes = [8, 32], strides = [1, 1]} : vector<8x128xf32> to vector<8x32xf32>
    %181 = vector.extract_strided_slice %178 {offsets = [0, 32], sizes = [8, 32], strides = [1, 1]} : vector<8x128xf32> to vector<8x32xf32>
    %182 = vector.extract_strided_slice %179 {offsets = [0, 64], sizes = [8, 32], strides = [1, 1]} : vector<8x128xf32> to vector<8x32xf32>
    %183 = vector.extract_strided_slice %178 {offsets = [0, 96], sizes = [8, 32], strides = [1, 1]} : vector<8x128xf32> to vector<8x32xf32>
    %184 = arith.mulf %181, %149 : vector<8x32xf32>
    %185 = arith.mulf %180, %182 : vector<8x32xf32>
    %186 = arith.addf %184, %185 : vector<8x32xf32>
    %187 = math.tanh %186 : vector<8x32xf32>
    %188 = arith.mulf %183, %187 : vector<8x32xf32>
    %cst_40 = arith.constant dense<0.000000e+00> : vector<8x128xf32>
    %189 = tpu.matmul %188, %13, %cst_40 {dimension_numbers = #tpu.dot_dimension_numbers<[1], [0], [0], [1], [0, 0, 1, 1], [], []>} : vector<8x32xf32>, vector<32x128xf32>, vector<8x128xf32> -> vector<8x128xf32>
    %190 = arith.addf %189, %170 : vector<8x128xf32>
    %191 = arith.addf %190, %17 : vector<8x128xf32>
    %192 = arith.negf %191 : vector<8x128xf32>
    %193 = math.exp %192 : vector<8x128xf32>
    %cst_41 = arith.constant 1.000000e+00 : f32
    %194 = vector.broadcast %cst_41 : f32 to vector<8x128xf32>
    %195 = arith.addf %194, %193 : vector<8x128xf32>
    %196 = arith.divf %194, %195 : vector<8x128xf32>
    %197 = math.tanh %191 : vector<8x128xf32>
    %198 = vector.extract_strided_slice %196 {offsets = [0, 0], sizes = [8, 32], strides = [1, 1]} : vector<8x128xf32> to vector<8x32xf32>
    %199 = vector.extract_strided_slice %196 {offsets = [0, 32], sizes = [8, 32], strides = [1, 1]} : vector<8x128xf32> to vector<8x32xf32>
    %200 = vector.extract_strided_slice %197 {offsets = [0, 64], sizes = [8, 32], strides = [1, 1]} : vector<8x128xf32> to vector<8x32xf32>
    %201 = vector.extract_strided_slice %196 {offsets = [0, 96], sizes = [8, 32], strides = [1, 1]} : vector<8x128xf32> to vector<8x32xf32>
    %202 = arith.mulf %199, %167 : vector<8x32xf32>
    %203 = arith.mulf %198, %200 : vector<8x32xf32>
    %204 = arith.addf %202, %203 : vector<8x32xf32>
    %205 = math.tanh %204 : vector<8x32xf32>
    %206 = arith.mulf %201, %205 : vector<8x32xf32>
    %cst_42 = arith.constant dense<0.000000e+00> : vector<8x128xf32>
    %207 = tpu.matmul %206, %14, %cst_42 {dimension_numbers = #tpu.dot_dimension_numbers<[1], [0], [0], [1], [0, 0, 1, 1], [], []>} : vector<8x32xf32>, vector<32x128xf32>, vector<8x128xf32> -> vector<8x128xf32>
    %208 = vector.extract_strided_slice %11 {offsets = [40, 0], sizes = [8, 128], strides = [1, 1]} : vector<64x128xf32> to vector<8x128xf32>
    %cst_43 = arith.constant dense<0.000000e+00> : vector<8x128xf32>
    %209 = tpu.matmul %188, %12, %cst_43 {dimension_numbers = #tpu.dot_dimension_numbers<[1], [0], [0], [1], [0, 0, 1, 1], [], []>} : vector<8x32xf32>, vector<32x128xf32>, vector<8x128xf32> -> vector<8x128xf32>
    %210 = arith.addf %208, %209 : vector<8x128xf32>
    %211 = arith.negf %210 : vector<8x128xf32>
    %212 = math.exp %211 : vector<8x128xf32>
    %cst_44 = arith.constant 1.000000e+00 : f32
    %213 = vector.broadcast %cst_44 : f32 to vector<8x128xf32>
    %214 = arith.addf %213, %212 : vector<8x128xf32>
    %215 = arith.divf %213, %214 : vector<8x128xf32>
    %216 = math.tanh %210 : vector<8x128xf32>
    %217 = vector.extract_strided_slice %215 {offsets = [0, 0], sizes = [8, 32], strides = [1, 1]} : vector<8x128xf32> to vector<8x32xf32>
    %218 = vector.extract_strided_slice %215 {offsets = [0, 32], sizes = [8, 32], strides = [1, 1]} : vector<8x128xf32> to vector<8x32xf32>
    %219 = vector.extract_strided_slice %216 {offsets = [0, 64], sizes = [8, 32], strides = [1, 1]} : vector<8x128xf32> to vector<8x32xf32>
    %220 = vector.extract_strided_slice %215 {offsets = [0, 96], sizes = [8, 32], strides = [1, 1]} : vector<8x128xf32> to vector<8x32xf32>
    %221 = arith.mulf %218, %186 : vector<8x32xf32>
    %222 = arith.mulf %217, %219 : vector<8x32xf32>
    %223 = arith.addf %221, %222 : vector<8x32xf32>
    %224 = math.tanh %223 : vector<8x32xf32>
    %225 = arith.mulf %220, %224 : vector<8x32xf32>
    %cst_45 = arith.constant dense<0.000000e+00> : vector<8x128xf32>
    %226 = tpu.matmul %225, %13, %cst_45 {dimension_numbers = #tpu.dot_dimension_numbers<[1], [0], [0], [1], [0, 0, 1, 1], [], []>} : vector<8x32xf32>, vector<32x128xf32>, vector<8x128xf32> -> vector<8x128xf32>
    %227 = arith.addf %226, %207 : vector<8x128xf32>
    %228 = arith.addf %227, %17 : vector<8x128xf32>
    %229 = arith.negf %228 : vector<8x128xf32>
    %230 = math.exp %229 : vector<8x128xf32>
    %cst_46 = arith.constant 1.000000e+00 : f32
    %231 = vector.broadcast %cst_46 : f32 to vector<8x128xf32>
    %232 = arith.addf %231, %230 : vector<8x128xf32>
    %233 = arith.divf %231, %232 : vector<8x128xf32>
    %234 = math.tanh %228 : vector<8x128xf32>
    %235 = vector.extract_strided_slice %233 {offsets = [0, 0], sizes = [8, 32], strides = [1, 1]} : vector<8x128xf32> to vector<8x32xf32>
    %236 = vector.extract_strided_slice %233 {offsets = [0, 32], sizes = [8, 32], strides = [1, 1]} : vector<8x128xf32> to vector<8x32xf32>
    %237 = vector.extract_strided_slice %234 {offsets = [0, 64], sizes = [8, 32], strides = [1, 1]} : vector<8x128xf32> to vector<8x32xf32>
    %238 = vector.extract_strided_slice %233 {offsets = [0, 96], sizes = [8, 32], strides = [1, 1]} : vector<8x128xf32> to vector<8x32xf32>
    %239 = arith.mulf %236, %204 : vector<8x32xf32>
    %240 = arith.mulf %235, %237 : vector<8x32xf32>
    %241 = arith.addf %239, %240 : vector<8x32xf32>
    %242 = math.tanh %241 : vector<8x32xf32>
    %243 = arith.mulf %238, %242 : vector<8x32xf32>
    %cst_47 = arith.constant dense<0.000000e+00> : vector<8x128xf32>
    %244 = tpu.matmul %243, %14, %cst_47 {dimension_numbers = #tpu.dot_dimension_numbers<[1], [0], [0], [1], [0, 0, 1, 1], [], []>} : vector<8x32xf32>, vector<32x128xf32>, vector<8x128xf32> -> vector<8x128xf32>
    %245 = vector.extract_strided_slice %11 {offsets = [48, 0], sizes = [8, 128], strides = [1, 1]} : vector<64x128xf32> to vector<8x128xf32>
    %cst_48 = arith.constant dense<0.000000e+00> : vector<8x128xf32>
    %246 = tpu.matmul %225, %12, %cst_48 {dimension_numbers = #tpu.dot_dimension_numbers<[1], [0], [0], [1], [0, 0, 1, 1], [], []>} : vector<8x32xf32>, vector<32x128xf32>, vector<8x128xf32> -> vector<8x128xf32>
    %247 = arith.addf %245, %246 : vector<8x128xf32>
    %248 = arith.negf %247 : vector<8x128xf32>
    %249 = math.exp %248 : vector<8x128xf32>
    %cst_49 = arith.constant 1.000000e+00 : f32
    %250 = vector.broadcast %cst_49 : f32 to vector<8x128xf32>
    %251 = arith.addf %250, %249 : vector<8x128xf32>
    %252 = arith.divf %250, %251 : vector<8x128xf32>
    %253 = math.tanh %247 : vector<8x128xf32>
    %254 = vector.extract_strided_slice %252 {offsets = [0, 0], sizes = [8, 32], strides = [1, 1]} : vector<8x128xf32> to vector<8x32xf32>
    %255 = vector.extract_strided_slice %252 {offsets = [0, 32], sizes = [8, 32], strides = [1, 1]} : vector<8x128xf32> to vector<8x32xf32>
    %256 = vector.extract_strided_slice %253 {offsets = [0, 64], sizes = [8, 32], strides = [1, 1]} : vector<8x128xf32> to vector<8x32xf32>
    %257 = vector.extract_strided_slice %252 {offsets = [0, 96], sizes = [8, 32], strides = [1, 1]} : vector<8x128xf32> to vector<8x32xf32>
    %258 = arith.mulf %255, %223 : vector<8x32xf32>
    %259 = arith.mulf %254, %256 : vector<8x32xf32>
    %260 = arith.addf %258, %259 : vector<8x32xf32>
    %261 = math.tanh %260 : vector<8x32xf32>
    %262 = arith.mulf %257, %261 : vector<8x32xf32>
    %cst_50 = arith.constant dense<0.000000e+00> : vector<8x128xf32>
    %263 = tpu.matmul %262, %13, %cst_50 {dimension_numbers = #tpu.dot_dimension_numbers<[1], [0], [0], [1], [0, 0, 1, 1], [], []>} : vector<8x32xf32>, vector<32x128xf32>, vector<8x128xf32> -> vector<8x128xf32>
    %264 = arith.addf %263, %244 : vector<8x128xf32>
    %265 = arith.addf %264, %17 : vector<8x128xf32>
    %266 = arith.negf %265 : vector<8x128xf32>
    %267 = math.exp %266 : vector<8x128xf32>
    %cst_51 = arith.constant 1.000000e+00 : f32
    %268 = vector.broadcast %cst_51 : f32 to vector<8x128xf32>
    %269 = arith.addf %268, %267 : vector<8x128xf32>
    %270 = arith.divf %268, %269 : vector<8x128xf32>
    %271 = math.tanh %265 : vector<8x128xf32>
    %272 = vector.extract_strided_slice %270 {offsets = [0, 0], sizes = [8, 32], strides = [1, 1]} : vector<8x128xf32> to vector<8x32xf32>
    %273 = vector.extract_strided_slice %270 {offsets = [0, 32], sizes = [8, 32], strides = [1, 1]} : vector<8x128xf32> to vector<8x32xf32>
    %274 = vector.extract_strided_slice %271 {offsets = [0, 64], sizes = [8, 32], strides = [1, 1]} : vector<8x128xf32> to vector<8x32xf32>
    %275 = vector.extract_strided_slice %270 {offsets = [0, 96], sizes = [8, 32], strides = [1, 1]} : vector<8x128xf32> to vector<8x32xf32>
    %276 = arith.mulf %273, %241 : vector<8x32xf32>
    %277 = arith.mulf %272, %274 : vector<8x32xf32>
    %278 = arith.addf %276, %277 : vector<8x32xf32>
    %279 = math.tanh %278 : vector<8x32xf32>
    %280 = arith.mulf %275, %279 : vector<8x32xf32>
    %cst_52 = arith.constant dense<0.000000e+00> : vector<8x128xf32>
    %281 = tpu.matmul %280, %14, %cst_52 {dimension_numbers = #tpu.dot_dimension_numbers<[1], [0], [0], [1], [0, 0, 1, 1], [], []>} : vector<8x32xf32>, vector<32x128xf32>, vector<8x128xf32> -> vector<8x128xf32>
    %282 = vector.extract_strided_slice %11 {offsets = [56, 0], sizes = [8, 128], strides = [1, 1]} : vector<64x128xf32> to vector<8x128xf32>
    %cst_53 = arith.constant dense<0.000000e+00> : vector<8x128xf32>
    %283 = tpu.matmul %262, %12, %cst_53 {dimension_numbers = #tpu.dot_dimension_numbers<[1], [0], [0], [1], [0, 0, 1, 1], [], []>} : vector<8x32xf32>, vector<32x128xf32>, vector<8x128xf32> -> vector<8x128xf32>
    %284 = arith.addf %282, %283 : vector<8x128xf32>
    %285 = arith.negf %284 : vector<8x128xf32>
    %286 = math.exp %285 : vector<8x128xf32>
    %cst_54 = arith.constant 1.000000e+00 : f32
    %287 = vector.broadcast %cst_54 : f32 to vector<8x128xf32>
    %288 = arith.addf %287, %286 : vector<8x128xf32>
    %289 = arith.divf %287, %288 : vector<8x128xf32>
    %290 = math.tanh %284 : vector<8x128xf32>
    %291 = vector.extract_strided_slice %289 {offsets = [0, 0], sizes = [8, 32], strides = [1, 1]} : vector<8x128xf32> to vector<8x32xf32>
    %292 = vector.extract_strided_slice %289 {offsets = [0, 32], sizes = [8, 32], strides = [1, 1]} : vector<8x128xf32> to vector<8x32xf32>
    %293 = vector.extract_strided_slice %290 {offsets = [0, 64], sizes = [8, 32], strides = [1, 1]} : vector<8x128xf32> to vector<8x32xf32>
    %294 = vector.extract_strided_slice %289 {offsets = [0, 96], sizes = [8, 32], strides = [1, 1]} : vector<8x128xf32> to vector<8x32xf32>
    %295 = arith.mulf %292, %260 : vector<8x32xf32>
    %296 = arith.mulf %291, %293 : vector<8x32xf32>
    %297 = arith.addf %295, %296 : vector<8x32xf32>
    %298 = math.tanh %297 : vector<8x32xf32>
    %299 = arith.mulf %294, %298 : vector<8x32xf32>
    %cst_55 = arith.constant dense<0.000000e+00> : vector<8x128xf32>
    %300 = tpu.matmul %299, %13, %cst_55 {dimension_numbers = #tpu.dot_dimension_numbers<[1], [0], [0], [1], [0, 0, 1, 1], [], []>} : vector<8x32xf32>, vector<32x128xf32>, vector<8x128xf32> -> vector<8x128xf32>
    %301 = arith.addf %300, %281 : vector<8x128xf32>
    %302 = arith.addf %301, %17 : vector<8x128xf32>
    %303 = arith.negf %302 : vector<8x128xf32>
    %304 = math.exp %303 : vector<8x128xf32>
    %cst_56 = arith.constant 1.000000e+00 : f32
    %305 = vector.broadcast %cst_56 : f32 to vector<8x128xf32>
    %306 = arith.addf %305, %304 : vector<8x128xf32>
    %307 = arith.divf %305, %306 : vector<8x128xf32>
    %308 = math.tanh %302 : vector<8x128xf32>
    %309 = vector.extract_strided_slice %307 {offsets = [0, 0], sizes = [8, 32], strides = [1, 1]} : vector<8x128xf32> to vector<8x32xf32>
    %310 = vector.extract_strided_slice %307 {offsets = [0, 32], sizes = [8, 32], strides = [1, 1]} : vector<8x128xf32> to vector<8x32xf32>
    %311 = vector.extract_strided_slice %308 {offsets = [0, 64], sizes = [8, 32], strides = [1, 1]} : vector<8x128xf32> to vector<8x32xf32>
    %312 = vector.extract_strided_slice %307 {offsets = [0, 96], sizes = [8, 32], strides = [1, 1]} : vector<8x128xf32> to vector<8x32xf32>
    %313 = arith.mulf %310, %278 : vector<8x32xf32>
    %314 = arith.mulf %309, %311 : vector<8x32xf32>
    %315 = arith.addf %313, %314 : vector<8x32xf32>
    %316 = math.tanh %315 : vector<8x32xf32>
    %317 = arith.mulf %312, %316 : vector<8x32xf32>
    %c0_i32_57 = arith.constant 0 : i32
    %318 = tpu.memref_slice %arg17[%c0_i32_57] : memref<3x!tpu.dma_semaphore, #tpu.memory_space<semaphore_mem>> -> memref<1x!tpu.dma_semaphore, #tpu.memory_space<semaphore_mem>>
    %319 = tpu.memref_squeeze %318 : memref<1x!tpu.dma_semaphore, #tpu.memory_space<semaphore_mem>> -> memref<!tpu.dma_semaphore, #tpu.memory_space<semaphore_mem>>
    tpu.wait_dma2 semaphore(%319 : memref<!tpu.dma_semaphore, #tpu.memory_space<semaphore_mem>>) src(%arg7 : memref<32x512xf32, #tpu.memory_space<any>>) dst(%arg14 : memref<32x512xf32, #tpu.memory_space<vmem>>)
    %c1_i32_58 = arith.constant 1 : i32
    %320 = tpu.memref_slice %arg17[%c1_i32_58] : memref<3x!tpu.dma_semaphore, #tpu.memory_space<semaphore_mem>> -> memref<1x!tpu.dma_semaphore, #tpu.memory_space<semaphore_mem>>
    %321 = tpu.memref_squeeze %320 : memref<1x!tpu.dma_semaphore, #tpu.memory_space<semaphore_mem>> -> memref<!tpu.dma_semaphore, #tpu.memory_space<semaphore_mem>>
    tpu.wait_dma2 semaphore(%321 : memref<!tpu.dma_semaphore, #tpu.memory_space<semaphore_mem>>) src(%arg9 : memref<512x128xf32, #tpu.memory_space<any>>) dst(%arg15 : memref<512x128xf32, #tpu.memory_space<vmem>>)
    %c2_i32_59 = arith.constant 2 : i32
    %322 = tpu.memref_slice %arg17[%c2_i32_59] : memref<3x!tpu.dma_semaphore, #tpu.memory_space<semaphore_mem>> -> memref<1x!tpu.dma_semaphore, #tpu.memory_space<semaphore_mem>>
    %323 = tpu.memref_squeeze %322 : memref<1x!tpu.dma_semaphore, #tpu.memory_space<semaphore_mem>> -> memref<!tpu.dma_semaphore, #tpu.memory_space<semaphore_mem>>
    tpu.wait_dma2 semaphore(%323 : memref<!tpu.dma_semaphore, #tpu.memory_space<semaphore_mem>>) src(%arg11 : memref<128x4xf32, #tpu.memory_space<any>>) dst(%arg16 : memref<128x4xf32, #tpu.memory_space<vmem>>)
    %c0_60 = arith.constant 0 : index
    %c0_61 = arith.constant 0 : index
    %324 = vector.load %arg14[%c0_60, %c0_61] : memref<32x512xf32, #tpu.memory_space<vmem>>, vector<32x512xf32>
    %cst_62 = arith.constant dense<0.000000e+00> : vector<8x512xf32>
    %325 = tpu.matmul %317, %324, %cst_62 {dimension_numbers = #tpu.dot_dimension_numbers<[1], [0], [0], [1], [0, 0, 1, 1], [], []>} : vector<8x32xf32>, vector<32x512xf32>, vector<8x512xf32> -> vector<8x512xf32>
    %c0_63 = arith.constant 0 : index
    %c0_64 = arith.constant 0 : index
    %326 = vector.load %arg8[%c0_63, %c0_64] : memref<1x512xf32, #tpu.memory_space<vmem>>, vector<1x512xf32>
    %327 = vector.broadcast %326 : vector<1x512xf32> to vector<8x512xf32>
    %328 = arith.addf %325, %327 : vector<8x512xf32>
    %cst_65 = arith.constant 0.000000e+00 : f32
    %329 = vector.broadcast %cst_65 : f32 to vector<8x512xf32>
    %330 = arith.maximumf %328, %329 : vector<8x512xf32>
    %c0_66 = arith.constant 0 : index
    %c0_67 = arith.constant 0 : index
    %331 = vector.load %arg15[%c0_66, %c0_67] : memref<512x128xf32, #tpu.memory_space<vmem>>, vector<512x128xf32>
    %cst_68 = arith.constant dense<0.000000e+00> : vector<8x128xf32>
    %332 = tpu.matmul %330, %331, %cst_68 {dimension_numbers = #tpu.dot_dimension_numbers<[1], [0], [0], [1], [0, 0, 1, 1], [], []>} : vector<8x512xf32>, vector<512x128xf32>, vector<8x128xf32> -> vector<8x128xf32>
    %c0_69 = arith.constant 0 : index
    %c0_70 = arith.constant 0 : index
    %333 = vector.load %arg10[%c0_69, %c0_70] : memref<1x128xf32, #tpu.memory_space<vmem>>, vector<1x128xf32>
    %334 = vector.broadcast %333 : vector<1x128xf32> to vector<8x128xf32>
    %335 = arith.addf %332, %334 : vector<8x128xf32>
    %cst_71 = arith.constant 0.000000e+00 : f32
    %336 = vector.broadcast %cst_71 : f32 to vector<8x128xf32>
    %337 = arith.maximumf %335, %336 : vector<8x128xf32>
    %c0_72 = arith.constant 0 : index
    %c0_73 = arith.constant 0 : index
    %338 = vector.load %arg16[%c0_72, %c0_73] : memref<128x4xf32, #tpu.memory_space<vmem>>, vector<128x4xf32>
    %cst_74 = arith.constant dense<0.000000e+00> : vector<8x4xf32>
    %339 = tpu.matmul %337, %338, %cst_74 {dimension_numbers = #tpu.dot_dimension_numbers<[1], [0], [0], [1], [0, 0, 1, 1], [], []>} : vector<8x128xf32>, vector<128x4xf32>, vector<8x4xf32> -> vector<8x4xf32>
    %c0_75 = arith.constant 0 : index
    %c0_76 = arith.constant 0 : index
    %340 = vector.load %arg12[%c0_75, %c0_76] : memref<1x4xf32, #tpu.memory_space<vmem>>, vector<1x4xf32>
    %341 = vector.broadcast %340 : vector<1x4xf32> to vector<8x4xf32>
    %342 = arith.addf %339, %341 : vector<8x4xf32>
    %c0_77 = arith.constant 0 : index
    %c0_78 = arith.constant 0 : index
    %343 = vector.load %arg13[%c0_77, %c0_78] : memref<8x4xf32, #tpu.memory_space<vmem>>, vector<8x4xf32>
    tpu.vector_store %arg13[%c0_77, %c0_78], %342 {strides = array<i32>} : memref<8x4xf32, #tpu.memory_space<vmem>>, vector<8x4xf32>,
    return
  }
}

</mosaic_0001>

<bundles_post_ra>
// kernel: tpu_custom_call.1
= control target key start
LH: loop header
LB: loop body
LE: loop exit
PB: predicated region body
PF: predicated region fallthrough
CT: control target
= control target key end

     0   :  { %18 = vsyncpa [#allocation7], 0  ;;  %s4097_s25 = smov [#allocation6]   ;;  %s4817_s0 = inlined_call_operand.vmem [shape: f32[64,8], index: 0, kind: input, shape index: {}]   ;;  %s4818_s1 = inlined_call_operand.hbm [shape: f32[8,128], index: 1, kind: input, shape index: {}]   ;;  %s4819_s2 = inlined_call_operand.vmem [shape: f32[32,128], index: 2, kind: input, shape index: {}]   ;;  %s4820_s3 = inlined_call_operand.vmem [shape: f32[1,128], index: 3, kind: input, shape index: {}]   ;;  %s4821_s4 = inlined_call_operand.vmem [shape: f32[32,128], index: 4, kind: input, shape index: {}]   ;;  %s4822_s5 = inlined_call_operand.vmem [shape: f32[32,128], index: 5, kind: input, shape index: {}]   ;;  %s4823_s6 = inlined_call_operand.vmem [shape: f32[1,128], index: 6, kind: input, shape index: {}]   ;;  %s4824_s7 = inlined_call_operand.vmem [shape: f32[32,512], index: 7, kind: input, shape index: {}]   ;;  %s4825_s8 = inlined_call_operand.vmem [shape: f32[1,512], index: 8, kind: input, shape index: {}]   ;;  %s4826_s9 = inlined_call_operand.hbm [shape: f32[512,128], index: 9, kind: input, shape index: {}]   ;;  %s4827_s10 = inlined_call_operand.vmem [shape: f32[1,128], index: 10, kind: input, shape index: {}]   ;;  %s4828_s11 = inlined_call_operand.vmem [shape: f32[128,4], index: 11, kind: input, shape index: {}]   ;;  %s4829_s12 = inlined_call_operand.vmem [shape: f32[1,4], index: 12, kind: input, shape index: {}]   ;;  %s4830_s13 = inlined_call_operand.vmem [shape: f32[8,4], index: 13, kind: output, shape index: {}]  }
   0x1   :  { %s27_s26 = sshll.u32 %s4097_s25, 4  ;;  %s4045_s29 = scalar_lea.hbm %s4818_s1, 128  ;;  %s28_s26 = int_to_ptr.vmem [resolvable:$true] %s27_s26 }
   0x2   :  { %p4046_p0 = scmp.ne.s32.totalorder %s4818_s1, %s4045_s29  ;;  %p4049_p1 = scmp.lt.u32.totalorder %s4045_s29, %s4818_s1 }
   0x4   :  { %p4051_p2 = pnand %p4049_p1, %p4046_p0 }
   0x6   :  { %4054 = shalt.err (!%p4051_p2)
}
   0x7   :  { %s4055_s17 = scalar_lea.vmem %s28_s26, 128  ;;  %p4060_p4 = scmp.lt.s32.totalorder %s28_s26, %s28_s26 }
   0x8   :  { %p4056_p3 = scmp.ne.s32.totalorder %s28_s26, %s4055_s17  ;;  %p4061_p5 = scmp.lt.s32.totalorder %s4055_s17, %s4055_s17 }
   0xa   :  { %p4062_p6 = por %p4061_p5, %p4060_p4 }
   0xc   :  { %p4063_p7 = pnand %p4062_p6, %p4056_p3 }
   0xe   :  { %4066 = shalt.err (!%p4063_p7)
}
   0xf   :  { %30 = dma.hbm_to_vmem [thread:$0]  %s4818_s1, 128, %s28_s26, [#allocation7]  }
  0x10   :  { %4089 = dma.done.wait [#allocation7], 128  }
  0x11   :  { %4090 = vsyncadd [#allocation7], 4294967168  ;;  %v4189_v0 = vld [vmem:[%s4824_s7] sm:$0xff]  ;;  %v4194_v1 = vld [vmem:[%s4824_s7 + $0x8] sm:$0xff] }
  0x12   :  { %v4199_v2 = vld [vmem:[%s4824_s7 + $0x10] sm:$0xff]  ;;  %v4204_v3 = vld [vmem:[%s4824_s7 + $0x18] sm:$0xff]  ;;  %v4209_v4 = vld [vmem:[%s4824_s7 + $0x20] sm:$0xff] }
  0x13   :  { %v4214_v5 = vld [vmem:[%s4824_s7 + $0x28] sm:$0xff]  ;;  %v4219_v6 = vld [vmem:[%s4824_s7 + $0x30] sm:$0xff]  ;;  %v4224_v7 = vld [vmem:[%s4824_s7 + $0x38] sm:$0xff] }
  0x14   :  { %v4229_v8 = vld [vmem:[%s4824_s7 + $0x40] sm:$0xff]  ;;  %v4234_v9 = vld [vmem:[%s4824_s7 + $0x48] sm:$0xff]  ;;  %v4239_v10 = vld [vmem:[%s4824_s7 + $0x50] sm:$0xff] }
  0x15   :  { %v4244_v11 = vld [vmem:[%s4824_s7 + $0x58] sm:$0xff]  ;;  %v4249_v12 = vld [vmem:[%s4824_s7 + $0x60] sm:$0xff]  ;;  %v4254_v13 = vld [vmem:[%s4824_s7 + $0x68] sm:$0xff] }
  0x16   :  { %v4259_v14 = vld [vmem:[%s4824_s7 + $0x70] sm:$0xff]  ;;  %v4264_v15 = vld [vmem:[%s4824_s7 + $0x78] sm:$0xff] }
  0x17   :  { %121 = vsyncadd [#allocation5], 2048  ;;  %v4269_v16 = vld [vmem:[%s4828_s11] sm:$0xff]  ;;  %v4274_v17 = vld [vmem:[%s4828_s11 + $0x8] sm:$0xff]  ;;  %s4098_s20 = smov [#allocation3]   ;;  %s4067_s17 = scalar_lea.hbm %s4826_s9, 8192 }
  0x18   :  { %s130_s21 = sshll.u32 %s4098_s20, 4  ;;  %v4279_v18 = vld [vmem:[%s4828_s11 + $0x10] sm:$0xff]  ;;  %v4284_v19 = vld [vmem:[%s4828_s11 + $0x18] sm:$0xff]  ;;  %v4289_v20 = vld [vmem:[%s4828_s11 + $0x20] sm:$0xff]  ;;  %p4068_p8 = scmp.ne.s32.totalorder %s4826_s9, %s4067_s17  ;;  %s131_s21 = int_to_ptr.vmem [resolvable:$true] %s130_s21 }
  0x19   :  { %v4294_v21 = vld [vmem:[%s4828_s11 + $0x28] sm:$0xff]  ;;  %v4299_v22 = vld [vmem:[%s4828_s11 + $0x30] sm:$0xff]  ;;  %v4304_v23 = vld [vmem:[%s4828_s11 + $0x38] sm:$0xff]  ;;  %p4071_p9 = scmp.lt.u32.totalorder %s4067_s17, %s4826_s9 }
  0x1b   :  { %p4073_p10 = pnand %p4071_p9, %p4068_p8 }
  0x1d   :  { %4076 = shalt.err (!%p4073_p10)  }
  0x1e   :  { %s4077_s23 = scalar_lea.vmem %s131_s21, 8192  ;;  %p4082_p12 = scmp.lt.s32.totalorder %s131_s21, %s131_s21 }
  0x1f   :  { %p4078_p11 = scmp.ne.s32.totalorder %s131_s21, %s4077_s23  ;;  %p4083_p13 = scmp.lt.s32.totalorder %s4077_s23, %s4077_s23 }
  0x21   :  { %p4084_p0 = por %p4083_p13, %p4082_p12 }
  0x23   :  { %p4085_p1 = pnand %p4084_p0, %p4078_p11 }
  0x25   :  { %4088 = shalt.err (!%p4085_p1)  }
  0x26   :  { %133 = dma.hbm_to_vmem [thread:$0]  %s4826_s9, 8192, %s131_s21, [#allocation5 + $0x1]  ;;  %v4321_v24 = vld [vmem:[%s4828_s11 + $0x40] sm:$0xff]  ;;  %v4326_v25 = vld [vmem:[%s4828_s11 + $0x48] sm:$0xff]  ;;  %v4331_v26 = vld [vmem:[%s4828_s11 + $0x50] sm:$0xff] }
  0x27   :  { %v4336_v27 = vld [vmem:[%s4828_s11 + $0x58] sm:$0xff]  ;;  %v4341_v28 = vld [vmem:[%s4828_s11 + $0x60] sm:$0xff]  ;;  %v4346_v29 = vld [vmem:[%s4828_s11 + $0x68] sm:$0xff] }
  0x28   :  { %v4351_v30 = vld [vmem:[%s4828_s11 + $0x70] sm:$0xff]  ;;  %v4356_v31 = vld [vmem:[%s4828_s11 + $0x78] sm:$0xff] }
  0x29   :  { %206 = vsyncadd [#allocation5 + $0x2], 2048  ;;  %v215_v32 = vld [vmem:[#allocation6] sm:$0xff]  ;;  %vm223_vm0 = vcmask 64512   ;;  %v208_v34 = vld [vmem:[%s4817_s0 + $0x8] sm:$0xff]  ;;  %v4099_v39 = vmov 0.0|0.0  }
  0x2a   :  { %v207_v33 = vld [vmem:[%s4817_s0] sm:$0xff]  ;;  %3349 = vmatprep.subr.mxu1 %v215_v32  ;;  %v362_v36 = vld [vmem:[%s4822_s5 + $0x8] sm:$0xff]  ;;  %v209_v38 = vld [vmem:[%s4817_s0 + $0x10] sm:$0xff]  ;;  %3674 = vmatprep.subr.bf16.mxu0 %v4099_v39  ;;  %vm4100_vm1 = vmmov 0   ;;  %v4101_v45 = vmov 0.0   ;;  %s4103_s29 = smov 32  }
  0x2b   :  { %3351 = vmatprep.mubr.msk.f32.mxu1 %vm223_vm0, %v207_v33  ;;  %v361_v35 = vld [vmem:[%s4822_s5] sm:$0xff]  ;;  %3350 = vmatpush3.msra.mxu1 %v215_v32  ;;  %v363_v40 = vld [vmem:[%s4822_s5 + $0x10] sm:$0xff]  ;;  %v364_v41 = vld [vmem:[%s4822_s5 + $0x18] sm:$0xff]  ;;  %vm372_vm2 = vcmask 261120  }
  0x2c   :  { %v4371_v37 = vpack.c.bf16 %v362_v36, %v361_v35  ;;  %3352 = vmatmul.mubr.msk.f32.vlgmr.msra.gmra.mrb[0].mxu1 %vm223_vm0, %v208_v34  ;;  %3662 = vmatprep.subr.bf16.mxu1 %v4099_v39  ;;  %v210_v42 = vld [vmem:[%s4817_s0 + $0x18] sm:$0xff]  ;;  %v4390_v43 = vpack.c.bf16 %v364_v41, %v363_v40  ;;  %v211_v44 = vld [vmem:[%s4817_s0 + $0x20] sm:$0xff]  ;;  %v212_v46 = vld [vmem:[%s4817_s0 + $0x28] sm:$0xff] }
  0x2d   :  { %3354 = vmatprep.mubr.msk.f32.mxu1 %vm223_vm0, %v209_v38  ;;  %3393 = vmatprep.mubr.msk.f32.mxu0 %vm4100_vm1, %v4101_v45  ;;  %v213_v47 = vld [vmem:[%s4817_s0 + $0x30] sm:$0xff]  ;;  %v214_v48 = vld [vmem:[%s4817_s0 + $0x38] sm:$0xff]  ;;  %v353_v49 = vld [vmem:[%s4819_s2] sm:$0xff] }
  0x2e   :  { %3664 = vmatpush3.bf16.msra.mxu1 %v4371_v37  ;;  %v354_v50 = vld [vmem:[%s4819_s2 + $0x8] sm:$0xff]  ;;  %v355_v52 = vld [vmem:[%s4819_s2 + $0x10] sm:$0xff]  ;;  %v356_v53 = vld [vmem:[%s4819_s2 + $0x18] sm:$0xff] }
  0x2f   :  { %3665 = vmatprep.subr.bf16.mxu1 %v4099_v39  ;;  %v4422_v51 = vpack.c.bf16 %v354_v50, %v353_v49  ;;  %v4432_v54 = vpack.c.bf16 %v356_v53, %v355_v52  ;;  %v3078_v55 = vld [vmem:[%s4820_s3] ss:$0 sm:$0xff]  ;;  %s4102_s3 = smov 64  }
  0x30   :  { %3355 = vmatmul.mubr.msk.f32.gmra.mrb[2].mxu1 %vm223_vm0, %v210_v42 }
  0x31   :  { %3357 = vmatprep.mubr.msk.f32.mxu1 %vm223_vm0, %v211_v44 }
  0x32   :  { %3667 = vmatpush3.bf16.msra.mxu1 %v4390_v43 }
  0x33   :  { %3668 = vmatprep.subr.bf16.mxu1 %v4099_v39 }
  0x34   :  { %3358 = vmatmul.mubr.msk.f32.gmra.mrb[4].mxu1 %vm223_vm0, %v212_v46 }
  0x35   :  { %3360 = vmatprep.mubr.msk.f32.mxu1 %vm223_vm0, %v213_v47 }
  0x38   :  { %3361 = vmatmul.mubr.msk.f32.gmra.mrb[6].mxu1 %vm223_vm0, %v214_v48 }
  0x39   :  { %3371 = vmatprep.mubr.msk.f32.mxu1 %vm4100_vm1, %v4101_v45 }
  0x3c   :  { %3372 = vmatmul.mubr.f32.vlgmr.msra.gmra.mrb[8].mxu1 %v4101_v45 }
  0x3d   :  { %3670 = vmatpush3.bf16.msra.mxu1 %v4422_v51  ;;  %3382 = vmatprep.mubr.msk.f32.mxu1 %vm4100_vm1, %v4101_v45 }
  0x3e   :  { %3671 = vmatprep.subr.bf16.mxu1 %v4099_v39 }
  0x41   :  { %3673 = vmatpush3.bf16.msra.mxu1 %v4432_v54 }
  0x42   :  { %3680 = vmatprep.subr.bf16.mxu1 %v4099_v39 }
  0x44   :  { %3383 = vmatmul.mubr.f32.vlgmr.msra.gmra.mrb[10].mxu1 %v4101_v45 }
  0x45   :  { %3682 = vmatpush3.bf16.msra.mxu1 %v4371_v37  ;;  %3404 = vmatprep.mubr.msk.f32.mxu1 %vm4100_vm1, %v4101_v45 }
  0x46   :  { %3683 = vmatprep.subr.bf16.mxu1 %v4099_v39 }
  0x49   :  { %3685 = vmatpush3.bf16.msra.mxu1 %v4390_v43 }
  0x4a   :  { %3692 = vmatprep.subr.bf16.mxu1 %v4099_v39 }
  0xff   :  { %v3353_v56 = vpop.f32.mrb[0].mxu1 }
 0x100   :  { %v4449_v57 = vadd.f32 %v3353_v56, %v3078_v55  ;;  %v314_v58 = vpop.f32.mrb[1].mxu1 }
 0x101   :  { %v315_v44 = vadd.f32 %v3078_v55, %v314_v58 }
 0x103   :  { %v3356_v59 = vpop.f32.mrb[2].mxu1 }
 0x104   :  { %v4451_v60 = vadd.f32 %v3356_v59, %v3078_v55  ;;  %v324_v61 = vpop.f32.mrb[3].mxu1 }
 0x105   :  { %v4453_v62 = vadd.f32 %v3078_v55, %v324_v61 }
 0x107   :  { %v3359_v63 = vpop.f32.mrb[4].mxu1 }
 0x108   :  { %v4455_v32 = vadd.f32 %v3359_v63, %v3078_v55  ;;  %v334_v33 = vpop.f32.mrb[5].mxu1 }
 0x109   :  { %v4457_v34 = vadd.f32 %v3078_v55, %v334_v33  ;;  %v357_v33 = vld [vmem:[%s4821_s4] sm:$0xff] }
 0x10b   :  { %v3362_v35 = vpop.f32.mrb[6].mxu1 }
 0x10c   :  { %v4459_v36 = vadd.f32 %v3362_v35, %v3078_v55  ;;  %v344_v38 = vpop.f32.mrb[7].mxu1  ;;  %v358_v35 = vld [vmem:[%s4821_s4 + $0x8] sm:$0xff] }
 0x10d   :  { %v4461_v40 = vadd.f32 %v3078_v55, %v344_v38  ;;  %v359_v38 = vld [vmem:[%s4821_s4 + $0x10] sm:$0xff] }
 0x10f   :  { %v442_v41 = vpop.f32.mrb[8].mxu1 }
 0x110   :  { %v3373_v42 = vpop.f32.mrb[9].mxu1 }
 0x111   :  { %v4477_v42 = vpack.c.bf16 %v358_v35, %v357_v33 }
 0x113   :  { %3676 = vmatpush3.bf16.msra.mxu0 %v4477_v42 }
 0x114   :  { %3677 = vmatprep.subr.bf16.mxu0 %v4099_v39 }
 0x117   :  { %v512_v46 = vpop.f32.mrb[10].mxu1 }
 0x118   :  { %v516_v47 = vadd.f32 %v512_v46, %v315_v44  ;;  %v3384_v48 = vpop.f32.mrb[11].mxu1  ;;  %v360_v44 = vld [vmem:[%s4821_s4 + $0x18] sm:$0xff] }
 0x119   :  { %v4483_v46 = vpack.c.bf16 %v360_v44, %v359_v38 }
 0x11a   :  { %3917 = vtanh.f32 %v516_v47  ;;  %v3088_v50 = vmul.f32 -1.442695, %v516_v47 }
 0x11b   :  { %3679 = vmatpush3.bf16.msra.mxu0 %v4483_v46 }
 0x11c   :  { %3919 = vpow2.f32 %v3088_v50  ;;  %3686 = vmatprep.subr.bf16.mxu0 %v4099_v39 }
 0x124   :  { %v3918_v49 = vpop.eup %3917 }
 0x125   :  { %526 = vrot.lane.b32.xlu0 %v3918_v49, %s4102_s3 }
 0x126   :  { %v3920_v52 = vpop.eup %3919 }
 0x127   :  { %v520_v53 = vadd.f32 1.0, %v3920_v52  ;;  %v4507_v52 = vld [vmem:[%s4823_s6] ss:$0 sm:$0xff] }
 0x129   :  { %3921 = vrcp.f32 %v520_v53 }
 0x133   :  { %v3922_v56 = vpop.eup %3921 }
 0x134   :  { %v524_v55 = vmul.f32 0.0, %v3922_v56 }
 0x197   :  { %v527_v59 = vpop.permute.xlu0 %526 }
 0x198   :  { %v529_v61 = vmul.f32 %v3922_v56, %v527_v59 }
 0x19a   :  { %531 = vrot.lane.b32.xlu0 %v529_v61, %s4103_s29 }
 0x20c   :  { %v532_v58 = vpop.permute.xlu0 %531 }
 0x20d   :  { %v4465_v63 = vadd.f32 %v532_v58, %v524_v55 }
 0x20f   :  { %3923 = vtanh.f32 %v4465_v63 }
 0x219   :  { %v3924_v47 = vpop.eup %3923 }
 0x21a   :  { %537 = vrot.lane.b32.xlu1 %v3924_v47, %s4102_s3 }
 0x28c   :  { %v538_v48 = vpop.permute.xlu1 %537 }
 0x28d   :  { %v540_v49 = vmul.f32 %v3922_v56, %v538_v48 }
 0x28f   :  { %542 = vrot.lane.b32.xlu1 %v540_v49, %s4103_s29 }
 0x301   :  { %v543_v50 = vpop.permute.xlu1 %542 }
 0x302   :  { %3394 = vmatmul.mubr.msk.f32.vlgmr.msra.gmra.mrb[0].mxu0 %vm372_vm2, %v543_v50 }
 0x303   :  { %3688 = vmatpush3.bf16.msra.mxu0 %v4422_v51  ;;  %3415 = vmatprep.mubr.msk.f32.mxu0 %vm4100_vm1, %v4101_v45 }
 0x304   :  { %3689 = vmatprep.subr.bf16.mxu0 %v4099_v39 }
 0x307   :  { %3691 = vmatpush3.bf16.msra.mxu0 %v4432_v54 }
 0x308   :  { %3698 = vmatprep.subr.bf16.mxu0 %v4099_v39 }
 0x30a   :  { %3416 = vmatmul.mubr.msk.f32.vlgmr.msra.gmra.mrb[2].mxu0 %vm372_vm2, %v543_v50 }
 0x30b   :  { %3700 = vmatpush3.bf16.msra.mxu0 %v4371_v37  ;;  %3437 = vmatprep.mubr.msk.f32.mxu0 %vm4100_vm1, %v4101_v45 }
 0x30c   :  { %3701 = vmatprep.subr.bf16.mxu0 %v4099_v39 }
 0x30f   :  { %3703 = vmatpush3.bf16.msra.mxu0 %v4390_v43 }
 0x310   :  { %3710 = vmatprep.subr.bf16.mxu0 %v4099_v39 }
 0x3d5   :  { %v612_v53 = vpop.f32.mrb[0].mxu0 }
 0x3d6   :  { %v613_v56 = vadd.f32 %v612_v53, %v442_v41  ;;  %v3395_v59 = vpop.f32.mrb[1].mxu0 }
 0x3d8   :  { %v616_v61 = vadd.f32 %v4507_v52, %v613_v56 }
 0x3da   :  { %3925 = vtanh.f32 %v616_v61  ;;  %v3090_v44 = vmul.f32 -1.442695, %v616_v61 }
 0x3dd   :  { %v782_v55 = vpop.f32.mrb[2].mxu0 }
 0x3de   :  { %v786_v58 = vadd.f32 %v782_v55, %v4449_v57  ;;  %v3417_v33 = vpop.f32.mrb[3].mxu0 }
 0x3e0   :  { %3927 = vtanh.f32 %v786_v58  ;;  %v3093_v47 = vmul.f32 -1.442695, %v786_v58 }
 0x3e1   :  { %3929 = vpow2.f32 %v3090_v44 }
 0x3e2   :  { %3931 = vpow2.f32 %v3093_v47 }
 0x3e4   :  { %v3926_v35 = vpop.eup %3925 }
 0x3e5   :  { %626 = vrot.lane.b32.xlu0 %v3926_v35, %s4102_s3 }
 0x3ea   :  { %v3928_v38 = vpop.eup %3927 }
 0x3eb   :  { %796 = vrot.lane.b32.xlu1 %v3928_v38, %s4102_s3  ;;  %v3930_v41 = vpop.eup %3929 }
 0x3ec   :  { %v620_v48 = vadd.f32 1.0, %v3930_v41  ;;  %v3932_v49 = vpop.eup %3931 }
 0x3ed   :  { %v790_v50 = vadd.f32 1.0, %v3932_v49 }
 0x3ee   :  { %3933 = vrcp.f32 %v620_v48 }
 0x3ef   :  { %3935 = vrcp.f32 %v790_v50 }
 0x3f8   :  { %v3934_v53 = vpop.eup %3933 }
 0x3f9   :  { %v3936_v59 = vpop.eup %3935  ;;  %v624_v61 = vmul.f32 0.0, %v3934_v53 }
 0x3fa   :  { %v794_v38 = vmul.f32 %v3936_v59, %v4465_v63 }
 0x457   :  { %v627_v57 = vpop.permute.xlu0 %626 }
 0x458   :  { %v629_v56 = vmul.f32 %v3934_v53, %v627_v57 }
 0x45a   :  { %631 = vrot.lane.b32.xlu0 %v629_v56, %s4103_s29 }
 0x45d   :  { %v797_v55 = vpop.permute.xlu1 %796 }
 0x45e   :  { %v799_v33 = vmul.f32 %v3936_v59, %v797_v55 }
 0x460   :  { %801 = vrot.lane.b32.xlu1 %v799_v33, %s4103_s29 }
 0x4cc   :  { %v632_v35 = vpop.permute.xlu0 %631 }
 0x4cd   :  { %v4515_v58 = vadd.f32 %v632_v35, %v624_v61 }
 0x4cf   :  { %3937 = vtanh.f32 %v4515_v58 }
 0x4d2   :  { %v802_v44 = vpop.permute.xlu1 %801 }
 0x4d3   :  { %v4519_v47 = vadd.f32 %v802_v44, %v794_v38 }
 0x4d5   :  { %3939 = vtanh.f32 %v4519_v47 }
 0x4d9   :  { %v3938_v41 = vpop.eup %3937 }
 0x4da   :  { %637 = vrot.lane.b32.xlu0 %v3938_v41, %s4102_s3 }
 0x4df   :  { %v3940_v48 = vpop.eup %3939 }
 0x4e0   :  { %807 = vrot.lane.b32.xlu1 %v3940_v48, %s4102_s3 }
 0x54c   :  { %v638_v49 = vpop.permute.xlu0 %637 }
 0x54d   :  { %v640_v50 = vmul.f32 %v3934_v53, %v638_v49 }
 0x54f   :  { %642 = vrot.lane.b32.xlu0 %v640_v50, %s4103_s29 }
 0x552   :  { %v808_v57 = vpop.permute.xlu1 %807 }
 0x553   :  { %v810_v56 = vmul.f32 %v3936_v59, %v808_v57 }
 0x555   :  { %812 = vrot.lane.b32.xlu1 %v810_v56, %s4103_s29 }
 0x5c1   :  { %v643_v63 = vpop.permute.xlu0 %642 }
 0x5c2   :  { %3405 = vmatmul.mubr.msk.f32.vlgmr.msra.gmra.mrb[12].mxu1 %vm372_vm2, %v643_v63 }
 0x5c3   :  { %3694 = vmatpush3.bf16.msra.mxu1 %v4477_v42  ;;  %3426 = vmatprep.mubr.msk.f32.mxu1 %vm4100_vm1, %v4101_v45 }
 0x5c4   :  { %3695 = vmatprep.subr.bf16.mxu1 %v4099_v39 }
 0x5c7   :  { %3697 = vmatpush3.bf16.msra.mxu1 %v4483_v46  ;;  %v813_v53 = vpop.permute.xlu1 %812 }
 0x5c8   :  { %3704 = vmatprep.subr.bf16.mxu1 %v4099_v39 }
 0x5ca   :  { %3427 = vmatmul.mubr.msk.f32.vlgmr.msra.gmra.mrb[14].mxu1 %vm372_vm2, %v813_v53 }
 0x5cb   :  { %3706 = vmatpush3.bf16.msra.mxu1 %v4422_v51  ;;  %3448 = vmatprep.mubr.msk.f32.mxu1 %vm4100_vm1, %v4101_v45 }
 0x5cc   :  { %3707 = vmatprep.subr.bf16.mxu1 %v4099_v39 }
 0x5cf   :  { %3709 = vmatpush3.bf16.msra.mxu1 %v4432_v54 }
 0x5d0   :  { %3716 = vmatprep.subr.bf16.mxu1 %v4099_v39 }
 0x5d2   :  { %3449 = vmatmul.mubr.msk.f32.vlgmr.msra.gmra.mrb[16].mxu1 %vm372_vm2, %v813_v53 }
 0x5d3   :  { %3718 = vmatpush3.bf16.msra.mxu1 %v4371_v37  ;;  %3470 = vmatprep.mubr.msk.f32.mxu1 %vm4100_vm1, %v4101_v45 }
 0x5d4   :  { %3719 = vmatprep.subr.bf16.mxu1 %v4099_v39 }
 0x5d7   :  { %3721 = vmatpush3.bf16.msra.mxu1 %v4390_v43 }
 0x5d8   :  { %3728 = vmatprep.subr.bf16.mxu1 %v4099_v39 }
 0x695   :  { %v712_v59 = vpop.f32.mrb[12].mxu1 }
 0x696   :  { %v3406_v55 = vpop.f32.mrb[13].mxu1 }
 0x69d   :  { %v882_v33 = vpop.f32.mrb[14].mxu1 }
 0x69e   :  { %v883_v61 = vadd.f32 %v882_v33, %v712_v59  ;;  %v3428_v35 = vpop.f32.mrb[15].mxu1 }
 0x6a0   :  { %v886_v38 = vadd.f32 %v4507_v52, %v883_v61 }
 0x6a2   :  { %3941 = vtanh.f32 %v886_v38  ;;  %v3095_v57 = vmul.f32 -1.442695, %v886_v38 }
 0x6a5   :  { %v1052_v44 = vpop.f32.mrb[16].mxu1 }
 0x6a6   :  { %v1056_v41 = vadd.f32 %v1052_v44, %v4453_v62  ;;  %v3450_v48 = vpop.f32.mrb[17].mxu1 }
 0x6a8   :  { %3943 = vtanh.f32 %v1056_v41  ;;  %v3098_v56 = vmul.f32 -1.442695, %v1056_v41 }
 0x6a9   :  { %3945 = vpow2.f32 %v3095_v57 }
 0x6aa   :  { %3947 = vpow2.f32 %v3098_v56 }
 0x6ac   :  { %v3942_v49 = vpop.eup %3941 }
 0x6ad   :  { %896 = vrot.lane.b32.xlu0 %v3942_v49, %s4102_s3 }
 0x6b2   :  { %v3944_v50 = vpop.eup %3943 }
 0x6b3   :  { %1066 = vrot.lane.b32.xlu1 %v3944_v50, %s4102_s3  ;;  %v3946_v63 = vpop.eup %3945 }
 0x6b4   :  { %v890_v53 = vadd.f32 1.0, %v3946_v63  ;;  %v3948_v59 = vpop.eup %3947 }
 0x6b5   :  { %v1060_v55 = vadd.f32 1.0, %v3948_v59 }
 0x6b6   :  { %3949 = vrcp.f32 %v890_v53 }
 0x6b7   :  { %3951 = vrcp.f32 %v1060_v55 }
 0x6c0   :  { %v3950_v33 = vpop.eup %3949 }
 0x6c1   :  { %v3952_v35 = vpop.eup %3951  ;;  %v894_v38 = vmul.f32 %v3950_v33, %v4515_v58 }
 0x6c2   :  { %v1064_v50 = vmul.f32 %v3952_v35, %v4519_v47 }
 0x71f   :  { %v897_v62 = vpop.permute.xlu0 %896 }
 0x720   :  { %v899_v61 = vmul.f32 %v3950_v33, %v897_v62 }
 0x722   :  { %901 = vrot.lane.b32.xlu0 %v899_v61, %s4103_s29 }
 0x725   :  { %v1067_v44 = vpop.permute.xlu1 %1066 }
 0x726   :  { %v1069_v48 = vmul.f32 %v3952_v35, %v1067_v44 }
 0x728   :  { %1071 = vrot.lane.b32.xlu1 %v1069_v48, %s4103_s29 }
 0x794   :  { %v902_v41 = vpop.permute.xlu0 %901 }
 0x795   :  { %v4554_v49 = vadd.f32 %v902_v41, %v894_v38 }
 0x797   :  { %3953 = vtanh.f32 %v4554_v49 }
 0x79a   :  { %v1072_v57 = vpop.permute.xlu1 %1071 }
 0x79b   :  { %v4558_v56 = vadd.f32 %v1072_v57, %v1064_v50 }
 0x79d   :  { %3955 = vtanh.f32 %v4558_v56 }
 0x7a1   :  { %v3954_v63 = vpop.eup %3953 }
 0x7a2   :  { %907 = vrot.lane.b32.xlu0 %v3954_v63, %s4102_s3 }
 0x7a7   :  { %v3956_v53 = vpop.eup %3955 }
 0x7a8   :  { %1077 = vrot.lane.b32.xlu1 %v3956_v53, %s4102_s3 }
 0x814   :  { %v908_v59 = vpop.permute.xlu0 %907 }
 0x815   :  { %v910_v58 = vmul.f32 %v3950_v33, %v908_v59 }
 0x817   :  { %912 = vrot.lane.b32.xlu0 %v910_v58, %s4103_s29 }
 0x81a   :  { %v1078_v55 = vpop.permute.xlu1 %1077 }
 0x81b   :  { %v1080_v62 = vmul.f32 %v3952_v35, %v1078_v55 }
 0x81d   :  { %1082 = vrot.lane.b32.xlu1 %v1080_v62, %s4103_s29 }
 0x889   :  { %v913_v47 = vpop.permute.xlu0 %912 }
 0x88a   :  { %3438 = vmatmul.mubr.msk.f32.vlgmr.msra.gmra.mrb[4].mxu0 %vm372_vm2, %v913_v47 }
 0x88b   :  { %3712 = vmatpush3.bf16.msra.mxu0 %v4477_v42  ;;  %3459 = vmatprep.mubr.msk.f32.mxu0 %vm4100_vm1, %v4101_v45 }
 0x88c   :  { %3713 = vmatprep.subr.bf16.mxu0 %v4099_v39 }
 0x88f   :  { %3715 = vmatpush3.bf16.msra.mxu0 %v4483_v46  ;;  %v1083_v61 = vpop.permute.xlu1 %1082 }
 0x890   :  { %3722 = vmatprep.subr.bf16.mxu0 %v4099_v39 }
 0x892   :  { %3460 = vmatmul.mubr.msk.f32.vlgmr.msra.gmra.mrb[6].mxu0 %vm372_vm2, %v1083_v61 }
 0x893   :  { %3724 = vmatpush3.bf16.msra.mxu0 %v4422_v51  ;;  %3481 = vmatprep.mubr.msk.f32.mxu0 %vm4100_vm1, %v4101_v45 }
 0x894   :  { %3725 = vmatprep.subr.bf16.mxu0 %v4099_v39 }
 0x897   :  { %3727 = vmatpush3.bf16.msra.mxu0 %v4432_v54 }
 0x898   :  { %3734 = vmatprep.subr.bf16.mxu0 %v4099_v39 }
 0x89a   :  { %3482 = vmatmul.mubr.msk.f32.vlgmr.msra.gmra.mrb[8].mxu0 %vm372_vm2, %v1083_v61 }
 0x89b   :  { %3736 = vmatpush3.bf16.msra.mxu0 %v4371_v37  ;;  %3503 = vmatprep.mubr.msk.f32.mxu0 %vm4100_vm1, %v4101_v45 }
 0x89c   :  { %3737 = vmatprep.subr.bf16.mxu0 %v4099_v39 }
 0x89f   :  { %3739 = vmatpush3.bf16.msra.mxu0 %v4390_v43 }
 0x8a0   :  { %3746 = vmatprep.subr.bf16.mxu0 %v4099_v39 }
 0x95d   :  { %v982_v33 = vpop.f32.mrb[4].mxu0 }
 0x95e   :  { %v3439_v35 = vpop.f32.mrb[5].mxu0 }
 0x965   :  { %v1152_v44 = vpop.f32.mrb[6].mxu0 }
 0x966   :  { %v1153_v48 = vadd.f32 %v1152_v44, %v982_v33  ;;  %v3461_v38 = vpop.f32.mrb[7].mxu0 }
 0x968   :  { %v1156_v41 = vadd.f32 %v4507_v52, %v1153_v48 }
 0x96a   :  { %3957 = vtanh.f32 %v1156_v41  ;;  %v3100_v58 = vmul.f32 -1.442695, %v1156_v41 }
 0x96d   :  { %v1322_v50 = vpop.f32.mrb[8].mxu0 }
 0x96e   :  { %v1326_v57 = vadd.f32 %v1322_v50, %v4451_v60  ;;  %v3483_v63 = vpop.f32.mrb[9].mxu0 }
 0x970   :  { %3959 = vtanh.f32 %v1326_v57  ;;  %v3103_v55 = vmul.f32 -1.442695, %v1326_v57 }
 0x971   :  { %3961 = vpow2.f32 %v3100_v58 }
 0x972   :  { %3963 = vpow2.f32 %v3103_v55 }
 0x974   :  { %v3958_v53 = vpop.eup %3957 }
 0x975   :  { %1166 = vrot.lane.b32.xlu0 %v3958_v53, %s4102_s3 }
 0x97a   :  { %v3960_v59 = vpop.eup %3959 }
 0x97b   :  { %1336 = vrot.lane.b32.xlu1 %v3960_v59, %s4102_s3  ;;  %v3962_v62 = vpop.eup %3961 }
 0x97c   :  { %v1160_v47 = vadd.f32 1.0, %v3962_v62  ;;  %v3964_v61 = vpop.eup %3963 }
 0x97d   :  { %v1330_v33 = vadd.f32 1.0, %v3964_v61 }
 0x97e   :  { %3965 = vrcp.f32 %v1160_v47 }
 0x97f   :  { %3967 = vrcp.f32 %v1330_v33 }
 0x988   :  { %v3966_v35 = vpop.eup %3965 }
 0x989   :  { %v3968_v48 = vpop.eup %3967  ;;  %v1164_v41 = vmul.f32 %v3966_v35, %v4554_v49 }
 0x98a   :  { %v1334_v53 = vmul.f32 %v3968_v48, %v4558_v56 }
 0x9e7   :  { %v1167_v60 = vpop.permute.xlu0 %1166 }
 0x9e8   :  { %v1169_v44 = vmul.f32 %v3966_v35, %v1167_v60 }
 0x9ea   :  { %1171 = vrot.lane.b32.xlu0 %v1169_v44, %s4103_s29 }
 0x9ed   :  { %v1337_v38 = vpop.permute.xlu1 %1336 }
 0x9ee   :  { %v1339_v50 = vmul.f32 %v3968_v48, %v1337_v38 }
 0x9f0   :  { %1341 = vrot.lane.b32.xlu1 %v1339_v50, %s4103_s29 }
 0xa5c   :  { %v1172_v57 = vpop.permute.xlu0 %1171 }
 0xa5d   :  { %v4593_v63 = vadd.f32 %v1172_v57, %v1164_v41 }
 0xa5f   :  { %3969 = vtanh.f32 %v4593_v63 }
 0xa62   :  { %v1342_v59 = vpop.permute.xlu1 %1341 }
 0xa63   :  { %v4597_v58 = vadd.f32 %v1342_v59, %v1334_v53 }
 0xa65   :  { %3971 = vtanh.f32 %v4597_v58 }
 0xa69   :  { %v3970_v55 = vpop.eup %3969 }
 0xa6a   :  { %1177 = vrot.lane.b32.xlu0 %v3970_v55, %s4102_s3 }
 0xa6f   :  { %v3972_v62 = vpop.eup %3971 }
 0xa70   :  { %1347 = vrot.lane.b32.xlu1 %v3972_v62, %s4102_s3 }
 0xadc   :  { %v1178_v47 = vpop.permute.xlu0 %1177 }
 0xadd   :  { %v1180_v49 = vmul.f32 %v3966_v35, %v1178_v47 }
 0xadf   :  { %1182 = vrot.lane.b32.xlu0 %v1180_v49, %s4103_s29 }
 0xae2   :  { %v1348_v61 = vpop.permute.xlu1 %1347 }
 0xae3   :  { %v1350_v33 = vmul.f32 %v3968_v48, %v1348_v61 }
 0xae5   :  { %1352 = vrot.lane.b32.xlu1 %v1350_v33, %s4103_s29 }
 0xb51   :  { %v1183_v56 = vpop.permute.xlu0 %1182 }
 0xb52   :  { %3471 = vmatmul.mubr.msk.f32.vlgmr.msra.gmra.mrb[18].mxu1 %vm372_vm2, %v1183_v56 }
 0xb53   :  { %3730 = vmatpush3.bf16.msra.mxu1 %v4477_v42  ;;  %3492 = vmatprep.mubr.msk.f32.mxu1 %vm4100_vm1, %v4101_v45 }
 0xb54   :  { %3731 = vmatprep.subr.bf16.mxu1 %v4099_v39 }
 0xb57   :  { %3733 = vmatpush3.bf16.msra.mxu1 %v4483_v46  ;;  %v1353_v60 = vpop.permute.xlu1 %1352 }
 0xb58   :  { %3740 = vmatprep.subr.bf16.mxu1 %v4099_v39 }
 0xb5a   :  { %3493 = vmatmul.mubr.msk.f32.vlgmr.msra.gmra.mrb[20].mxu1 %vm372_vm2, %v1353_v60 }
 0xb5b   :  { %3742 = vmatpush3.bf16.msra.mxu1 %v4422_v51  ;;  %3514 = vmatprep.mubr.msk.f32.mxu1 %vm4100_vm1, %v4101_v45 }
 0xb5c   :  { %3743 = vmatprep.subr.bf16.mxu1 %v4099_v39 }
 0xb5f   :  { %3745 = vmatpush3.bf16.msra.mxu1 %v4432_v54 }
 0xb60   :  { %3752 = vmatprep.subr.bf16.mxu1 %v4099_v39 }
 0xb62   :  { %3515 = vmatmul.mubr.msk.f32.vlgmr.msra.gmra.mrb[22].mxu1 %vm372_vm2, %v1353_v60 }
 0xb63   :  { %3754 = vmatpush3.bf16.msra.mxu1 %v4371_v37  ;;  %3536 = vmatprep.mubr.msk.f32.mxu1 %vm4100_vm1, %v4101_v45 }
 0xb64   :  { %3755 = vmatprep.subr.bf16.mxu1 %v4099_v39 }
 0xb67   :  { %3757 = vmatpush3.bf16.msra.mxu1 %v4390_v43 }
 0xb68   :  { %3764 = vmatprep.subr.bf16.mxu1 %v4099_v39 }
 0xc25   :  { %v1252_v35 = vpop.f32.mrb[18].mxu1 }
 0xc26   :  { %v3472_v44 = vpop.f32.mrb[19].mxu1 }
 0xc2d   :  { %v1422_v48 = vpop.f32.mrb[20].mxu1 }
 0xc2e   :  { %v1423_v38 = vadd.f32 %v1422_v48, %v1252_v35  ;;  %v3494_v50 = vpop.f32.mrb[21].mxu1 }
 0xc30   :  { %v1426_v41 = vadd.f32 %v4507_v52, %v1423_v38 }
 0xc32   :  { %3973 = vtanh.f32 %v1426_v41  ;;  %v3105_v47 = vmul.f32 -1.442695, %v1426_v41 }
 0xc35   :  { %v1592_v57 = vpop.f32.mrb[22].mxu1 }
 0xc36   :  { %v1596_v53 = vadd.f32 %v1592_v57, %v4457_v34  ;;  %v3516_v59 = vpop.f32.mrb[23].mxu1 }
 0xc38   :  { %3975 = vtanh.f32 %v1596_v53  ;;  %v3108_v49 = vmul.f32 -1.442695, %v1596_v53 }
 0xc39   :  { %3977 = vpow2.f32 %v3105_v47 }
 0xc3a   :  { %3979 = vpow2.f32 %v3108_v49 }
 0xc3c   :  { %v3974_v55 = vpop.eup %3973 }
 0xc3d   :  { %1436 = vrot.lane.b32.xlu0 %v3974_v55, %s4102_s3 }
 0xc42   :  { %v3976_v62 = vpop.eup %3975 }
 0xc43   :  { %1606 = vrot.lane.b32.xlu1 %v3976_v62, %s4102_s3  ;;  %v3978_v61 = vpop.eup %3977 }
 0xc44   :  { %v1430_v33 = vadd.f32 1.0, %v3978_v61  ;;  %v3980_v56 = vpop.eup %3979 }
 0xc45   :  { %v1600_v60 = vadd.f32 1.0, %v3980_v56 }
 0xc46   :  { %3981 = vrcp.f32 %v1430_v33 }
 0xc47   :  { %3983 = vrcp.f32 %v1600_v60 }
 0xc50   :  { %v3982_v35 = vpop.eup %3981 }
 0xc51   :  { %v3984_v48 = vpop.eup %3983  ;;  %v1434_v41 = vmul.f32 %v3982_v35, %v4593_v63 }
 0xc52   :  { %v1604_v59 = vmul.f32 %v3984_v48, %v4597_v58 }
 0xcaf   :  { %v1437_v34 = vpop.permute.xlu0 %1436 }
 0xcb0   :  { %v1439_v44 = vmul.f32 %v3982_v35, %v1437_v34 }
 0xcb2   :  { %1441 = vrot.lane.b32.xlu0 %v1439_v44, %s4103_s29 }
 0xcb5   :  { %v1607_v38 = vpop.permute.xlu1 %1606 }
 0xcb6   :  { %v1609_v50 = vmul.f32 %v3984_v48, %v1607_v38 }
 0xcb8   :  { %1611 = vrot.lane.b32.xlu1 %v1609_v50, %s4103_s29 }
 0xd24   :  { %v1442_v57 = vpop.permute.xlu0 %1441 }
 0xd25   :  { %v4632_v53 = vadd.f32 %v1442_v57, %v1434_v41 }
 0xd27   :  { %3985 = vtanh.f32 %v4632_v53 }
 0xd2a   :  { %v1612_v55 = vpop.permute.xlu1 %1611 }
 0xd2b   :  { %v4636_v62 = vadd.f32 %v1612_v55, %v1604_v59 }
 0xd2d   :  { %3987 = vtanh.f32 %v4636_v62 }
 0xd31   :  { %v3986_v47 = vpop.eup %3985 }
 0xd32   :  { %1447 = vrot.lane.b32.xlu0 %v3986_v47, %s4102_s3 }
 0xd37   :  { %v3988_v49 = vpop.eup %3987 }
 0xd38   :  { %1617 = vrot.lane.b32.xlu1 %v3988_v49, %s4102_s3 }
 0xda4   :  { %v1448_v61 = vpop.permute.xlu0 %1447 }
 0xda5   :  { %v1450_v63 = vmul.f32 %v3982_v35, %v1448_v61 }
 0xda7   :  { %1452 = vrot.lane.b32.xlu0 %v1450_v63, %s4103_s29 }
 0xdaa   :  { %v1618_v33 = vpop.permute.xlu1 %1617 }
 0xdab   :  { %v1620_v56 = vmul.f32 %v3984_v48, %v1618_v33 }
 0xdad   :  { %1622 = vrot.lane.b32.xlu1 %v1620_v56, %s4103_s29 }
 0xe19   :  { %v1453_v58 = vpop.permute.xlu0 %1452 }
 0xe1a   :  { %3504 = vmatmul.mubr.msk.f32.vlgmr.msra.gmra.mrb[10].mxu0 %vm372_vm2, %v1453_v58 }
 0xe1b   :  { %3748 = vmatpush3.bf16.msra.mxu0 %v4477_v42  ;;  %3525 = vmatprep.mubr.msk.f32.mxu0 %vm4100_vm1, %v4101_v45 }
 0xe1c   :  { %3749 = vmatprep.subr.bf16.mxu0 %v4099_v39 }
 0xe1f   :  { %3751 = vmatpush3.bf16.msra.mxu0 %v4483_v46  ;;  %v1623_v60 = vpop.permute.xlu1 %1622 }
 0xe20   :  { %3758 = vmatprep.subr.bf16.mxu0 %v4099_v39 }
 0xe22   :  { %3526 = vmatmul.mubr.msk.f32.vlgmr.msra.gmra.mrb[12].mxu0 %vm372_vm2, %v1623_v60 }
 0xe23   :  { %3760 = vmatpush3.bf16.msra.mxu0 %v4422_v51  ;;  %3547 = vmatprep.mubr.msk.f32.mxu0 %vm4100_vm1, %v4101_v45 }
 0xe24   :  { %3761 = vmatprep.subr.bf16.mxu0 %v4099_v39 }
 0xe27   :  { %3763 = vmatpush3.bf16.msra.mxu0 %v4432_v54 }
 0xe28   :  { %3770 = vmatprep.subr.bf16.mxu0 %v4099_v39 }
 0xe2a   :  { %3548 = vmatmul.mubr.msk.f32.vlgmr.msra.gmra.mrb[14].mxu0 %vm372_vm2, %v1623_v60 }
 0xe2b   :  { %3772 = vmatpush3.bf16.msra.mxu0 %v4371_v37  ;;  %3569 = vmatprep.mubr.msk.f32.mxu0 %vm4100_vm1, %v4101_v45 }
 0xe2c   :  { %3773 = vmatprep.subr.bf16.mxu0 %v4099_v39 }
 0xe2f   :  { %3775 = vmatpush3.bf16.msra.mxu0 %v4390_v43 }
 0xe30   :  { %3782 = vmatprep.subr.bf16.mxu0 %v4099_v39 }
 0xeed   :  { %v1522_v35 = vpop.f32.mrb[10].mxu0 }
 0xeee   :  { %v3505_v34 = vpop.f32.mrb[11].mxu0 }
 0xef5   :  { %v1692_v44 = vpop.f32.mrb[12].mxu0 }
 0xef6   :  { %v1693_v48 = vadd.f32 %v1692_v44, %v1522_v35  ;;  %v3527_v38 = vpop.f32.mrb[13].mxu0 }
 0xef8   :  { %v1696_v50 = vadd.f32 %v4507_v52, %v1693_v48 }
 0xefa   :  { %3989 = vtanh.f32 %v1696_v50  ;;  %v3110_v49 = vmul.f32 -1.442695, %v1696_v50 }
 0xefd   :  { %v1862_v41 = vpop.f32.mrb[14].mxu0 }
 0xefe   :  { %v1866_v57 = vadd.f32 %v1862_v41, %v4455_v32  ;;  %v3549_v59 = vpop.f32.mrb[15].mxu0 }
 0xf00   :  { %3991 = vtanh.f32 %v1866_v57  ;;  %v3113_v61 = vmul.f32 -1.442695, %v1866_v57 }
 0xf01   :  { %3993 = vpow2.f32 %v3110_v49 }
 0xf02   :  { %3995 = vpow2.f32 %v3113_v61 }
 0xf04   :  { %v3990_v55 = vpop.eup %3989 }
 0xf05   :  { %1706 = vrot.lane.b32.xlu0 %v3990_v55, %s4102_s3 }
 0xf0a   :  { %v3992_v47 = vpop.eup %3991 }
 0xf0b   :  { %1876 = vrot.lane.b32.xlu1 %v3992_v47, %s4102_s3  ;;  %v3994_v63 = vpop.eup %3993 }
 0xf0c   :  { %v1700_v33 = vadd.f32 1.0, %v3994_v63  ;;  %v3996_v56 = vpop.eup %3995 }
 0xf0d   :  { %v1870_v58 = vadd.f32 1.0, %v3996_v56 }
 0xf0e   :  { %3997 = vrcp.f32 %v1700_v33 }
 0xf0f   :  { %3999 = vrcp.f32 %v1870_v58 }
 0xf18   :  { %v3998_v60 = vpop.eup %3997 }
 0xf19   :  { %v4000_v34 = vpop.eup %3999  ;;  %v1704_v38 = vmul.f32 %v3998_v60, %v4632_v53 }
 0xf1a   :  { %v1874_v57 = vmul.f32 %v4000_v34, %v4636_v62 }
 0xf77   :  { %v1707_v32 = vpop.permute.xlu0 %1706 }
 0xf78   :  { %v1709_v35 = vmul.f32 %v3998_v60, %v1707_v32 }
 0xf7a   :  { %1711 = vrot.lane.b32.xlu0 %v1709_v35, %s4103_s29 }
 0xf7d   :  { %v1877_v44 = vpop.permute.xlu1 %1876 }
 0xf7e   :  { %v1879_v48 = vmul.f32 %v4000_v34, %v1877_v44 }
 0xf80   :  { %1881 = vrot.lane.b32.xlu1 %v1879_v48, %s4103_s29 }
 0xfec   :  { %v1712_v50 = vpop.permute.xlu0 %1711 }
 0xfed   :  { %v4671_v41 = vadd.f32 %v1712_v50, %v1704_v38 }
 0xfef   :  { %4001 = vtanh.f32 %v4671_v41 }
 0xff2   :  { %v1882_v59 = vpop.permute.xlu1 %1881 }
 0xff3   :  { %v4675_v55 = vadd.f32 %v1882_v59, %v1874_v57 }
 0xff5   :  { %4003 = vtanh.f32 %v4675_v55 }
 0xff9   :  { %v4002_v47 = vpop.eup %4001 }
 0xffa   :  { %1717 = vrot.lane.b32.xlu0 %v4002_v47, %s4102_s3 }
 0xfff   :  { %v4004_v49 = vpop.eup %4003 }
0x1000   :  { %1887 = vrot.lane.b32.xlu1 %v4004_v49, %s4102_s3 }
0x106c   :  { %v1718_v61 = vpop.permute.xlu0 %1717 }
0x106d   :  { %v1720_v53 = vmul.f32 %v3998_v60, %v1718_v61 }
0x106f   :  { %1722 = vrot.lane.b32.xlu0 %v1720_v53, %s4103_s29 }
0x1072   :  { %v1888_v63 = vpop.permute.xlu1 %1887 }
0x1073   :  { %v1890_v33 = vmul.f32 %v4000_v34, %v1888_v63 }
0x1075   :  { %1892 = vrot.lane.b32.xlu1 %v1890_v33, %s4103_s29 }
0x10e1   :  { %v1723_v62 = vpop.permute.xlu0 %1722 }
0x10e2   :  { %3537 = vmatmul.mubr.msk.f32.vlgmr.msra.gmra.mrb[24].mxu1 %vm372_vm2, %v1723_v62 }
0x10e3   :  { %3766 = vmatpush3.bf16.msra.mxu1 %v4477_v42  ;;  %3558 = vmatprep.mubr.msk.f32.mxu1 %vm4100_vm1, %v4101_v45 }
0x10e4   :  { %3767 = vmatprep.subr.bf16.mxu1 %v4099_v39 }
0x10e7   :  { %3769 = vmatpush3.bf16.msra.mxu1 %v4483_v46  ;;  %v1893_v56 = vpop.permute.xlu1 %1892 }
0x10e8   :  { %3776 = vmatprep.subr.bf16.mxu1 %v4099_v39 }
0x10ea   :  { %3559 = vmatmul.mubr.msk.f32.vlgmr.msra.gmra.mrb[26].mxu1 %vm372_vm2, %v1893_v56 }
0x10eb   :  { %3778 = vmatpush3.bf16.msra.mxu1 %v4422_v51  ;;  %3580 = vmatprep.mubr.msk.f32.mxu1 %vm4100_vm1, %v4101_v45 }
0x10ec   :  { %3779 = vmatprep.subr.bf16.mxu1 %v4099_v39 }
0x10ef   :  { %3781 = vmatpush3.bf16.msra.mxu1 %v4432_v54 }
0x10f0   :  { %3788 = vmatprep.subr.bf16.mxu1 %v4099_v39 }
0x10f2   :  { %3581 = vmatmul.mubr.msk.f32.vlgmr.msra.gmra.mrb[28].mxu1 %vm372_vm2, %v1893_v56 }
0x10f3   :  { %3790 = vmatpush3.bf16.msra.mxu1 %v4371_v37  ;;  %3602 = vmatprep.mubr.msk.f32.mxu1 %vm4100_vm1, %v4101_v45 }
0x10f4   :  { %3791 = vmatprep.subr.bf16.mxu1 %v4099_v39 }
0x10f7   :  { %3793 = vmatpush3.bf16.msra.mxu1 %v4390_v43 }
0x10f8   :  { %3800 = vmatprep.subr.bf16.mxu1 %v4099_v39 }
0x11b5   :  { %v1792_v58 = vpop.f32.mrb[24].mxu1 }
0x11b6   :  { %v3538_v60 = vpop.f32.mrb[25].mxu1 }
0x11bd   :  { %v1962_v32 = vpop.f32.mrb[26].mxu1 }
0x11be   :  { %v1963_v35 = vadd.f32 %v1962_v32, %v1792_v58  ;;  %v3560_v34 = vpop.f32.mrb[27].mxu1 }
0x11c0   :  { %v1966_v44 = vadd.f32 %v4507_v52, %v1963_v35 }
0x11c2   :  { %4005 = vtanh.f32 %v1966_v44  ;;  %v3115_v43 = vmul.f32 -1.442695, %v1966_v44 }
0x11c5   :  { %v2132_v48 = vpop.f32.mrb[28].mxu1 }
0x11c6   :  { %v2136_v37 = vadd.f32 %v2132_v48, %v4461_v40  ;;  %v3582_v38 = vpop.f32.mrb[29].mxu1 }
0x11c8   :  { %4007 = vtanh.f32 %v2136_v37  ;;  %v3118_v59 = vmul.f32 -1.442695, %v2136_v37 }
0x11c9   :  { %4009 = vpow2.f32 %v3115_v43 }
0x11ca   :  { %4011 = vpow2.f32 %v3118_v59 }
0x11cc   :  { %v4006_v50 = vpop.eup %4005 }
0x11cd   :  { %1976 = vrot.lane.b32.xlu0 %v4006_v50, %s4102_s3 }
0x11d2   :  { %v4008_v57 = vpop.eup %4007 }
0x11d3   :  { %2146 = vrot.lane.b32.xlu1 %v4008_v57, %s4102_s3  ;;  %v4010_v47 = vpop.eup %4009 }
0x11d4   :  { %v1970_v49 = vadd.f32 1.0, %v4010_v47  ;;  %v4012_v61 = vpop.eup %4011 }
0x11d5   :  { %v2140_v53 = vadd.f32 1.0, %v4012_v61 }
0x11d6   :  { %4013 = vrcp.f32 %v1970_v49 }
0x11d7   :  { %4015 = vrcp.f32 %v2140_v53 }
0x11e0   :  { %v4014_v63 = vpop.eup %4013 }
0x11e1   :  { %v4016_v62 = vpop.eup %4015  ;;  %v1974_v60 = vmul.f32 %v4014_v63, %v4671_v41 }
0x11e2   :  { %v2144_v34 = vmul.f32 %v4016_v62, %v4675_v55 }
0x123f   :  { %v1977_v40 = vpop.permute.xlu0 %1976 }
0x1240   :  { %v1979_v33 = vmul.f32 %v4014_v63, %v1977_v40 }
0x1242   :  { %1981 = vrot.lane.b32.xlu0 %v1979_v33, %s4103_s29 }
0x1245   :  { %v2147_v56 = vpop.permute.xlu1 %2146 }
0x1246   :  { %v2149_v58 = vmul.f32 %v4016_v62, %v2147_v56 }
0x1248   :  { %2151 = vrot.lane.b32.xlu1 %v2149_v58, %s4103_s29 }
0x12b4   :  { %v1982_v32 = vpop.permute.xlu0 %1981 }
0x12b5   :  { %v4710_v35 = vadd.f32 %v1982_v32, %v1974_v60 }
0x12b7   :  { %4017 = vtanh.f32 %v4710_v35 }
0x12ba   :  { %v2152_v44 = vpop.permute.xlu1 %2151 }
0x12bb   :  { %v4714_v48 = vadd.f32 %v2152_v44, %v2144_v34 }
0x12bd   :  { %4019 = vtanh.f32 %v4714_v48 }
0x12c1   :  { %v4018_v37 = vpop.eup %4017 }
0x12c2   :  { %1987 = vrot.lane.b32.xlu0 %v4018_v37, %s4102_s3 }
0x12c7   :  { %v4020_v38 = vpop.eup %4019 }
0x12c8   :  { %2157 = vrot.lane.b32.xlu1 %v4020_v38, %s4102_s3 }
0x1334   :  { %v1988_v50 = vpop.permute.xlu0 %1987 }
0x1335   :  { %v1990_v41 = vmul.f32 %v4014_v63, %v1988_v50 }
0x1337   :  { %1992 = vrot.lane.b32.xlu0 %v1990_v41, %s4103_s29 }
0x133a   :  { %v2158_v57 = vpop.permute.xlu1 %2157 }
0x133b   :  { %v2160_v43 = vmul.f32 %v4016_v62, %v2158_v57 }
0x133d   :  { %2162 = vrot.lane.b32.xlu1 %v2160_v43, %s4103_s29 }
0x13a9   :  { %v1993_v55 = vpop.permute.xlu0 %1992 }
0x13aa   :  { %3570 = vmatmul.mubr.msk.f32.vlgmr.msra.gmra.mrb[16].mxu0 %vm372_vm2, %v1993_v55 }
0x13ab   :  { %3784 = vmatpush3.bf16.msra.mxu0 %v4477_v42  ;;  %3591 = vmatprep.mubr.msk.f32.mxu0 %vm4100_vm1, %v4101_v45 }
0x13ac   :  { %3785 = vmatprep.subr.bf16.mxu0 %v4099_v39 }
0x13af   :  { %3787 = vmatpush3.bf16.msra.mxu0 %v4483_v46  ;;  %v2163_v59 = vpop.permute.xlu1 %2162 }
0x13b0   :  { %3794 = vmatprep.subr.bf16.mxu0 %v4099_v39 }
0x13b2   :  { %3592 = vmatmul.mubr.msk.f32.vlgmr.msra.gmra.mrb[18].mxu0 %vm372_vm2, %v2163_v59 }
0x13b3   :  { %3796 = vmatpush3.bf16.msra.mxu0 %v4422_v51  ;;  %3613 = vmatprep.mubr.msk.f32.mxu0 %vm4100_vm1, %v4101_v45 }
0x13b4   :  { %3797 = vmatprep.subr.bf16.mxu0 %v4099_v39 }
0x13b7   :  { %3799 = vmatpush3.bf16.msra.mxu0 %v4432_v54 }
0x13ba   :  { %3614 = vmatmul.mubr.msk.f32.vlgmr.msra.gmra.mrb[20].mxu0 %vm372_vm2, %v2163_v59 }
0x147d   :  { %v2062_v47 = vpop.f32.mrb[16].mxu0 }
0x147e   :  { %v3571_v49 = vpop.f32.mrb[17].mxu0 }
0x1485   :  { %v2232_v61 = vpop.f32.mrb[18].mxu0 }
0x1486   :  { %v2233_v53 = vadd.f32 %v2232_v61, %v2062_v47  ;;  %v3593_v63 = vpop.f32.mrb[19].mxu0 }
0x1488   :  { %v2236_v40 = vadd.f32 %v4507_v52, %v2233_v53 }
0x148a   :  { %4021 = vtanh.f32 %v2236_v40  ;;  %v3120_v54 = vmul.f32 -1.442695, %v2236_v40 }
0x148d   :  { %v2402_v33 = vpop.f32.mrb[20].mxu0 }
0x148e   :  { %v2406_v51 = vadd.f32 %v2402_v33, %v4459_v36  ;;  %v3615_v62 = vpop.f32.mrb[21].mxu0 }
0x1490   :  { %4023 = vtanh.f32 %v2406_v51  ;;  %v3123_v60 = vmul.f32 -1.442695, %v2406_v51 }
0x1491   :  { %4025 = vpow2.f32 %v3120_v54 }
0x1492   :  { %4027 = vpow2.f32 %v3123_v60 }
0x1494   :  { %v4022_v56 = vpop.eup %4021 }
0x1495   :  { %2246 = vrot.lane.b32.xlu0 %v4022_v56, %s4102_s3 }
0x149a   :  { %v4024_v58 = vpop.eup %4023 }
0x149b   :  { %2416 = vrot.lane.b32.xlu1 %v4024_v58, %s4102_s3  ;;  %v4026_v32 = vpop.eup %4025 }
0x149c   :  { %v2240_v34 = vadd.f32 1.0, %v4026_v32  ;;  %v4028_v44 = vpop.eup %4027 }
0x149d   :  { %v2410_v37 = vadd.f32 1.0, %v4028_v44 }
0x149e   :  { %4029 = vrcp.f32 %v2240_v34 }
0x149f   :  { %4031 = vrcp.f32 %v2410_v37 }
0x14a8   :  { %v4030_v38 = vpop.eup %4029 }
0x14a9   :  { %v4032_v41 = vpop.eup %4031  ;;  %v2244_v55 = vmul.f32 %v4030_v38, %v4710_v35 }
0x14aa   :  { %v2414_v49 = vmul.f32 %v4032_v41, %v4714_v48 }
0x1507   :  { %v2247_v36 = vpop.permute.xlu0 %2246 }
0x1508   :  { %v2249_v50 = vmul.f32 %v4030_v38, %v2247_v36 }
0x150a   :  { %2251 = vrot.lane.b32.xlu0 %v2249_v50, %s4103_s29 }
0x150d   :  { %v2417_v57 = vpop.permute.xlu1 %2416 }
0x150e   :  { %v2419_v43 = vmul.f32 %v4032_v41, %v2417_v57 }
0x1510   :  { %2421 = vrot.lane.b32.xlu1 %v2419_v43, %s4103_s29 }
0x157c   :  { %v2252_v59 = vpop.permute.xlu0 %2251 }
0x157d   :  { %v2254_v47 = vadd.f32 %v2252_v59, %v2244_v55 }
0x157f   :  { %4033 = vtanh.f32 %v2254_v47 }
0x1582   :  { %v2422_v61 = vpop.permute.xlu1 %2421 }
0x1583   :  { %v2424_v53 = vadd.f32 %v2422_v61, %v2414_v49 }
0x1585   :  { %4035 = vtanh.f32 %v2424_v53 }
0x1589   :  { %v4034_v63 = vpop.eup %4033 }
0x158a   :  { %2257 = vrot.lane.b32.xlu0 %v4034_v63, %s4102_s3 }
0x158f   :  { %v4036_v40 = vpop.eup %4035 }
0x1590   :  { %2427 = vrot.lane.b32.xlu1 %v4036_v40, %s4102_s3 }
0x15fc   :  { %v2258_v33 = vpop.permute.xlu0 %2257 }
0x15fd   :  { %v2260_v51 = vmul.f32 %v4030_v38, %v2258_v33 }
0x15ff   :  { %2262 = vrot.lane.b32.xlu0 %v2260_v51, %s4103_s29 }
0x1602   :  { %v2428_v62 = vpop.permute.xlu1 %2427 }
0x1603   :  { %v2430_v35 = vmul.f32 %v4032_v41, %v2428_v62 }
0x1605   :  { %2432 = vrot.lane.b32.xlu1 %v2430_v35, %s4103_s29 }
0x1671   :  { %v2263_v56 = vpop.permute.xlu0 %2262 }
0x1672   :  { %3603 = vmatmul.mubr.msk.f32.vlgmr.msra.gmra.mrb[30].mxu1 %vm372_vm2, %v2263_v56 }
0x1673   :  { %3802 = vmatpush3.bf16.msra.mxu1 %v4477_v42  ;;  %3624 = vmatprep.mubr.msk.f32.mxu1 %vm4100_vm1, %v4101_v45 }
0x1674   :  { %3803 = vmatprep.subr.bf16.mxu1 %v4099_v39 }
0x1677   :  { %3805 = vmatpush3.bf16.msra.mxu1 %v4483_v46  ;;  %v2433_v48 = vpop.permute.xlu1 %2432 }
0x167a   :  { %3625 = vmatmul.mubr.msk.f32.vlgmr.msra.gmra.mrb[32].mxu1 %vm372_vm2, %v2433_v48 }
0x1745   :  { %v2332_v58 = vpop.f32.mrb[30].mxu1 }
0x1746   :  { %v3604_v54 = vpop.f32.mrb[31].mxu1 }
0x174d   :  { %v2502_v60 = vpop.f32.mrb[32].mxu1 }
0x174e   :  { %v2503_v32 = vadd.f32 %v2502_v60, %v2332_v58  ;;  %v3626_v34 = vpop.f32.mrb[33].mxu1 }
0x1750   :  { %v2506_v44 = vadd.f32 %v4507_v52, %v2503_v32 }
0x1752   :  { %4037 = vtanh.f32 %v2506_v44  ;;  %v3125_v42 = vmul.f32 -1.442695, %v2506_v44 }
0x1754   :  { %4039 = vpow2.f32 %v3125_v42 }
0x175c   :  { %v4038_v37 = vpop.eup %4037 }
0x175d   :  { %2516 = vrot.lane.b32.xlu0 %v4038_v37, %s4102_s3 }
0x175e   :  { %v4040_v38 = vpop.eup %4039 }
0x175f   :  { %v2510_v36 = vadd.f32 1.0, %v4040_v38 }
0x1761   :  { %4041 = vrcp.f32 %v2510_v36 }
0x176b   :  { %v4042_v46 = vpop.eup %4041 }
0x176c   :  { %v2514_v57 = vmul.f32 %v4042_v46, %v2254_v47 }
0x17cf   :  { %v2517_v50 = vpop.permute.xlu0 %2516 }
0x17d0   :  { %v2519_v41 = vmul.f32 %v4042_v46, %v2517_v50 }
0x17d2   :  { %2521 = vrot.lane.b32.xlu1 %v2519_v41, %s4103_s29 }
0x1844   :  { %v2522_v43 = vpop.permute.xlu1 %2521 }
0x1845   :  { %v2524_v55 = vadd.f32 %v2522_v43, %v2514_v57 }
0x1847   :  { %4043 = vtanh.f32 %v2524_v55 }
0x1851   :  { %v4044_v59 = vpop.eup %4043 }
0x1852   :  { %2527 = vrot.lane.b32.xlu0 %v4044_v59, %s4102_s3 }
0x18c4   :  { %v2528_v52 = vpop.permute.xlu0 %2527 }
0x18c5   :  { %v2530_v49 = vmul.f32 %v4042_v46, %v2528_v52 }
0x18c6   :  { %4091 = dma.done.wait [#allocation5], 2048 }
0x18c7   :  { %4092 = vsyncadd [#allocation5], 4294965248 }
0x18c8   :  { %4093 = dma.done.wait [#allocation5 + $0x1], 8192 }
0x18c9   :  { %4094 = vsyncadd [#allocation5 + $0x1], 4294959104  ;;  %2580 = vrot.lane.b32.xlu0 %v2530_v49, %s4103_s29  ;;  %v3806_v61 = vpack.c.bf16 %v4214_v5, %v4194_v1  ;;  %v3814_v47 = vpack.c.bf16 %v4224_v7, %v4204_v3  ;;  %v3808_v53 = vpack.c.bf16 %v4209_v4, %v4189_v0  ;;  %v3816_v63 = vpack.c.bf16 %v4219_v6, %v4199_v2 }
0x18ca   :  { %4095 = dma.done.wait [#allocation5 + $0x2], 2048 }
0x18cb   :  { %4096 = vsyncadd [#allocation5 + $0x2], 4294965248  ;;  %v3810_v40 = vpack.c.bf16 %v4254_v13, %v4234_v9  ;;  %v3818_v33 = vpack.c.bf16 %v4264_v15, %v4244_v11  ;;  %2648 = vmatprep.mubr.f32.mxu0 %v4101_v45  ;;  %3807 = vmatprep.subr.bf16.mxu0 %v3806_v61  ;;  %v3812_v0 = vpack.c.bf16 %v4249_v12, %v4229_v8  ;;  %v2746_v2 = vld [vmem:[#allocation3 + $0x80] sm:$0xff]  ;;  %v2747_v3 = vld [vmem:[#allocation3 + $0x88] sm:$0xff]  ;;  %vm3035_vm3 = vcmask 31744  }
0x18cc   :  { %3815 = vmatprep.subr.bf16.mxu1 %v3814_v47  ;;  %3809 = vmatpush1.bf16.msra.mxu0 %v3808_v53  ;;  %v3820_v1 = vpack.c.bf16 %v4259_v14, %v4239_v10  ;;  %v2778_v4 = vld [vmem:[#allocation3 + $0x180] sm:$0xff]  ;;  %v3822_v5 = vpack.c.bf16 %v2747_v3, %v2746_v2  ;;  %v2779_v6 = vld [vmem:[#allocation3 + $0x188] sm:$0xff]  ;;  %v2748_v13 = vld [vmem:[#allocation3 + $0x90] sm:$0xff] }
0x18cd   :  { %3817 = vmatpush1.bf16.msra.mxu1 %v3816_v63  ;;  %3811 = vmatprep.subr.bf16.mxu0 %v3810_v40  ;;  %v3854_v7 = vpack.c.bf16 %v2779_v6, %v2778_v4  ;;  %v2730_v9 = vld [vmem:[#allocation3] sm:$0xff]  ;;  %v2731_v11 = vld [vmem:[#allocation3 + $0x8] sm:$0xff]  ;;  %v2749_v10 = vld [vmem:[#allocation3 + $0x98] sm:$0xff] }
0x18ce   :  { %3819 = vmatprep.subr.bf16.mxu1 %v3818_v33  ;;  %2719 = vmatprep.mubr.f32.mxu1 %v4101_v45  ;;  %v2762_v8 = vld [vmem:[#allocation3 + $0x100] sm:$0xff]  ;;  %v2763_v12 = vld [vmem:[#allocation3 + $0x108] sm:$0xff]  ;;  %v2780_v14 = vld [vmem:[#allocation3 + $0x190] sm:$0xff]  ;;  %v3824_v51 = vpack.c.bf16 %v2731_v11, %v2730_v9  ;;  %v3826_v48 = vpack.c.bf16 %v2749_v10, %v2748_v13 }
0x18cf   :  { %v2781_v15 = vld [vmem:[#allocation3 + $0x198] sm:$0xff]  ;;  %v3856_v62 = vpack.c.bf16 %v2763_v12, %v2762_v8  ;;  %v2732_v35 = vld [vmem:[#allocation3 + $0x10] sm:$0xff]  ;;  %v2750_v32 = vld [vmem:[#allocation3 + $0xa0] sm:$0xff] }
0x18d0   :  { %3813 = vmatpush1.bf16.msra.mxu0 %v3812_v0  ;;  %v2733_v56 = vld [vmem:[#allocation3 + $0x18] sm:$0xff]  ;;  %v3858_v58 = vpack.c.bf16 %v2781_v15, %v2780_v14  ;;  %v2764_v54 = vld [vmem:[#allocation3 + $0x110] sm:$0xff]  ;;  %v2751_v44 = vld [vmem:[#allocation3 + $0xa8] sm:$0xff] }
0x18d1   :  { %3821 = vmatpush1.bf16.msra.mxu1 %v3820_v1  ;;  %3823 = vmatprep.subr.bf16.mxu0 %v3822_v5  ;;  %v2765_v60 = vld [vmem:[#allocation3 + $0x118] sm:$0xff]  ;;  %v2782_v37 = vld [vmem:[#allocation3 + $0x1a0] sm:$0xff]  ;;  %v2783_v42 = vld [vmem:[#allocation3 + $0x1a8] sm:$0xff]  ;;  %v3828_v38 = vpack.c.bf16 %v2733_v56, %v2732_v35  ;;  %v3830_v41 = vpack.c.bf16 %v2751_v44, %v2750_v32 }
0x18d2   :  { %3855 = vmatprep.subr.bf16.mxu1 %v3854_v7  ;;  %v3860_v36 = vpack.c.bf16 %v2765_v60, %v2764_v54  ;;  %v2734_v46 = vld [vmem:[#allocation3 + $0x20] sm:$0xff]  ;;  %v2735_v50 = vld [vmem:[#allocation3 + $0x28] sm:$0xff]  ;;  %v3862_v57 = vpack.c.bf16 %v2783_v42, %v2782_v37  ;;  %v2752_v59 = vld [vmem:[#allocation3 + $0xb0] sm:$0xff] }
0x18d3   :  { %v2766_v43 = vld [vmem:[#allocation3 + $0x120] sm:$0xff]  ;;  %v2767_v55 = vld [vmem:[#allocation3 + $0x128] sm:$0xff]  ;;  %v2753_v52 = vld [vmem:[#allocation3 + $0xb8] sm:$0xff]  ;;  %v3832_v47 = vpack.c.bf16 %v2735_v50, %v2734_v46 }
0x18d4   :  { %v2784_v49 = vld [vmem:[#allocation3 + $0x1b0] sm:$0xff]  ;;  %v2785_v61 = vld [vmem:[#allocation3 + $0x1b8] sm:$0xff]  ;;  %v3864_v53 = vpack.c.bf16 %v2767_v55, %v2766_v43  ;;  %v3834_v33 = vpack.c.bf16 %v2753_v52, %v2752_v59  ;;  %v2754_v3 = vld [vmem:[#allocation3 + $0xc0] sm:$0xff] }
0x18d5   :  { %v2736_v63 = vld [vmem:[#allocation3 + $0x30] sm:$0xff]  ;;  %v2737_v40 = vld [vmem:[#allocation3 + $0x38] sm:$0xff]  ;;  %v3866_v0 = vpack.c.bf16 %v2785_v61, %v2784_v49  ;;  %v2755_v4 = vld [vmem:[#allocation3 + $0xc8] sm:$0xff] }
0x18d6   :  { %v2768_v1 = vld [vmem:[#allocation3 + $0x130] sm:$0xff]  ;;  %v2769_v2 = vld [vmem:[#allocation3 + $0x138] sm:$0xff]  ;;  %v2786_v5 = vld [vmem:[#allocation3 + $0x1c0] sm:$0xff]  ;;  %v3836_v7 = vpack.c.bf16 %v2737_v40, %v2736_v63  ;;  %v3838_v12 = vpack.c.bf16 %v2755_v4, %v2754_v3 }
0x18d7   :  { %v2787_v6 = vld [vmem:[#allocation3 + $0x1c8] sm:$0xff]  ;;  %v3868_v9 = vpack.c.bf16 %v2769_v2, %v2768_v1  ;;  %v2738_v11 = vld [vmem:[#allocation3 + $0x40] sm:$0xff]  ;;  %v2756_v15 = vld [vmem:[#allocation3 + $0xd0] sm:$0xff] }
0x18d8   :  { %v2739_v8 = vld [vmem:[#allocation3 + $0x48] sm:$0xff]  ;;  %v3870_v13 = vpack.c.bf16 %v2787_v6, %v2786_v5  ;;  %v2770_v10 = vld [vmem:[#allocation3 + $0x140] sm:$0xff]  ;;  %v2789_v35 = vld [vmem:[#allocation3 + $0x1d8] sm:$0xff] }
0x18d9   :  { %v2771_v14 = vld [vmem:[#allocation3 + $0x148] sm:$0xff]  ;;  %v3840_v56 = vpack.c.bf16 %v2739_v8, %v2738_v11  ;;  %v2741_v54 = vld [vmem:[#allocation3 + $0x58] sm:$0xff]  ;;  %v2758_v37 = vld [vmem:[#allocation3 + $0xe0] sm:$0xff] }
0x18da   :  { %v2773_v44 = vld [vmem:[#allocation3 + $0x158] sm:$0xff]  ;;  %v2759_v42 = vld [vmem:[#allocation3 + $0xe8] sm:$0xff]  ;;  %v2742_v43 = vld [vmem:[#allocation3 + $0x60] sm:$0xff] }
0x18db   :  { %v2743_v55 = vld [vmem:[#allocation3 + $0x68] sm:$0xff]  ;;  %v2774_v59 = vld [vmem:[#allocation3 + $0x160] sm:$0xff]  ;;  %v2792_v63 = vld [vmem:[#allocation3 + $0x1f0] sm:$0xff] }
0x18dc   :  { %v3848_v52 = vpack.c.bf16 %v2743_v55, %v2742_v43  ;;  %v2775_v49 = vld [vmem:[#allocation3 + $0x168] sm:$0xff]  ;;  %v2745_v1 = vld [vmem:[#allocation3 + $0x78] sm:$0xff]  ;;  %v2776_v4 = vld [vmem:[#allocation3 + $0x170] sm:$0xff] }
0x18dd   :  { %v3880_v61 = vpack.c.bf16 %v2775_v49, %v2774_v59  ;;  %v2777_v5 = vld [vmem:[#allocation3 + $0x178] sm:$0xff] }
0x18de   :  { %v3884_v6 = vpack.c.bf16 %v2777_v5, %v2776_v4 }
0x193b   :  { %v2581_v34 = vpop.permute.xlu0 %2580 }
0x193c   :  { %3126 = vmatmul.mubr.msk.f32.vlgmr.msra.gmra.mrb[22].mxu0 %vm372_vm2, %v2581_v34  ;;  %3127 = vmatmul.mubr.msk.f32.vlgmr.msra.gmra.mrb[34].mxu1 %vm372_vm2, %v2581_v34  ;;  %v2772_v34 = vld [vmem:[#allocation3 + $0x150] sm:$0xff] }
0x193d   :  { %3825 = vmatpush3.bf16.msra.mxu0 %v3824_v51  ;;  %3857 = vmatpush3.bf16.msra.mxu1 %v3856_v62  ;;  %v2757_v51 = vld [vmem:[#allocation3 + $0xd8] sm:$0xff]  ;;  %v2788_v62 = vld [vmem:[#allocation3 + $0x1d0] sm:$0xff]  ;;  %v3876_v50 = vpack.c.bf16 %v2773_v44, %v2772_v34 }
0x193e   :  { %3827 = vmatprep.subr.bf16.mxu0 %v3826_v48  ;;  %3859 = vmatprep.subr.bf16.mxu1 %v3858_v58  ;;  %v3872_v48 = vpack.c.bf16 %v2771_v14, %v2770_v10  ;;  %v2740_v58 = vld [vmem:[#allocation3 + $0x50] sm:$0xff]  ;;  %v3842_v60 = vpack.c.bf16 %v2757_v51, %v2756_v15  ;;  %v3874_v32 = vpack.c.bf16 %v2789_v35, %v2788_v62 }
0x193f   :  { %v3844_v46 = vpack.c.bf16 %v2741_v54, %v2740_v58 }
0x1941   :  { %3829 = vmatpush3.bf16.msra.mxu0 %v3828_v38  ;;  %3861 = vmatpush3.bf16.msra.mxu1 %v3860_v36  ;;  %v2790_v38 = vld [vmem:[#allocation3 + $0x1e0] sm:$0xff]  ;;  %v2791_v36 = vld [vmem:[#allocation3 + $0x1e8] sm:$0xff] }
0x1942   :  { %3831 = vmatprep.subr.bf16.mxu0 %v3830_v41  ;;  %3863 = vmatprep.subr.bf16.mxu1 %v3862_v57  ;;  %v3846_v41 = vpack.c.bf16 %v2759_v42, %v2758_v37  ;;  %v3878_v57 = vpack.c.bf16 %v2791_v36, %v2790_v38  ;;  %v3887_v42 = vpack.c.bf16 %v4274_v17, %v4269_v16 }
0x1943   :  { %v3896_v16 = vpack.c.bf16 %v4304_v23, %v4299_v22  ;;  %v3899_v17 = vpack.c.bf16 %v4326_v25, %v4321_v24  ;;  %v3128_v23 = vld [vmem:[%s4827_s10] ss:$0 sm:$0xff] }
0x1945   :  { %3833 = vmatpush3.bf16.msra.mxu0 %v3832_v47  ;;  %3865 = vmatpush3.bf16.msra.mxu1 %v3864_v53  ;;  %v2760_v47 = vld [vmem:[#allocation3 + $0xf0] sm:$0xff]  ;;  %v2761_v53 = vld [vmem:[#allocation3 + $0xf8] sm:$0xff] }
0x1946   :  { %3835 = vmatprep.subr.bf16.mxu0 %v3834_v33  ;;  %3867 = vmatprep.subr.bf16.mxu1 %v3866_v0  ;;  %v3850_v40 = vpack.c.bf16 %v2761_v53, %v2760_v47  ;;  %v2793_v33 = vld [vmem:[#allocation3 + $0x1f8] sm:$0xff]  ;;  %v2744_v0 = vld [vmem:[#allocation3 + $0x70] sm:$0xff] }
0x1947   :  { %v3882_v2 = vpack.c.bf16 %v2793_v33, %v2792_v63  ;;  %v3852_v3 = vpack.c.bf16 %v2745_v1, %v2744_v0 }
0x1949   :  { %3837 = vmatpush3.bf16.msra.mxu0 %v3836_v7  ;;  %3869 = vmatpush3.bf16.msra.mxu1 %v3868_v9  ;;  %v2559_v7 = vlaneseq }
0x194a   :  { %3839 = vmatprep.subr.bf16.mxu0 %v3838_v12  ;;  %3871 = vmatprep.subr.bf16.mxu1 %v3870_v13  ;;  %v2557_v12 = vld [vmem:[%s4825_s8] sm:$0xf] }
0x194b   :  { %v2560_v9 = vshrl.u32 %v2559_v7, 7 }
0x194d   :  { %3841 = vmatpush3.bf16.msra.mxu0 %v3840_v56  ;;  %3873 = vmatpush3.bf16.msra.mxu1 %v3872_v48  ;;  %v2561_v11 = vsub.s32 0, %v2560_v9  ;;  %v2569_v8 = vsub.s32 2, %v2560_v9  ;;  %v2565_v13 = vsub.s32 1, %v2560_v9  ;;  %v2573_v10 = vsub.s32 3, %v2560_v9 }
0x194e   :  { %3843 = vmatprep.subr.bf16.mxu0 %v3842_v60  ;;  %3875 = vmatprep.subr.bf16.mxu1 %v3874_v32 }
0x194f   :  { %v2562_v14 = vrot.slane %v2557_v12, %v2561_v11  ;;  %v2570_v15 = vrot.slane %v2557_v12, %v2569_v8  ;;  %v2566_v51 = vrot.slane %v2557_v12, %v2565_v13  ;;  %v2574_v62 = vrot.slane %v2557_v12, %v2573_v10 }
0x1951   :  { %3845 = vmatpush3.bf16.msra.mxu0 %v3844_v46  ;;  %3877 = vmatpush3.bf16.msra.mxu1 %v3876_v50  ;;  %v3890_v46 = vpack.c.bf16 %v4284_v19, %v4279_v18  ;;  %v3893_v50 = vpack.c.bf16 %v4294_v21, %v4289_v20  ;;  %v3902_v18 = vpack.c.bf16 %v4336_v27, %v4331_v26 }
0x1952   :  { %3847 = vmatprep.subr.bf16.mxu0 %v3846_v41  ;;  %3879 = vmatprep.subr.bf16.mxu1 %v3878_v57  ;;  %v3905_v19 = vpack.c.bf16 %v4346_v29, %v4341_v28  ;;  %v3908_v20 = vpack.c.bf16 %v4356_v31, %v4351_v30  ;;  %v3129_v29 = vld [vmem:[%s4829_s12] ss:$0 sm:$0xff] }
0x1955   :  { %3849 = vmatpush3.bf16.msra.mxu0 %v3848_v52  ;;  %3881 = vmatpush3.bf16.msra.mxu1 %v3880_v61 }
0x1956   :  { %3851 = vmatprep.subr.bf16.mxu0 %v3850_v40  ;;  %3883 = vmatprep.subr.bf16.mxu1 %v3882_v2 }
0x1959   :  { %3853 = vmatpush3.bf16.msra.mxu0 %v3852_v3  ;;  %3885 = vmatpush3.bf16.msra.mxu1 %v3884_v6 }
0x195a   :  { %3886 = vmatprep.subr.bf16.mxu0 %v4099_v39 }
0x1a0f   :  { %v2650_v35 = vpop.f32.mrb[22].mxu0  ;;  %v2721_v56 = vpop.f32.mrb[34].mxu1 }
0x1a10   :  { %v2651_v48 = vadd.f32 %v2650_v35, %v2562_v14  ;;  %v2722_v58 = vadd.f32 %v2721_v56, %v2570_v15  ;;  %v2652_v54 = vpop.f32.mrb[23].mxu0  ;;  %v2723_v60 = vpop.f32.mrb[35].mxu1 }
0x1a11   :  { %v2653_v32 = vadd.f32 %v2652_v54, %v2566_v51  ;;  %v2724_v34 = vadd.f32 %v2723_v60, %v2574_v62 }
0x1a12   :  { %v2726_v38 = vmax.f32 %v2651_v48, 0.0  ;;  %v2728_v36 = vmax.f32 %v2722_v58, 0.0 }
0x1a13   :  { %v2727_v44 = vmax.f32 %v2653_v32, 0.0  ;;  %v2729_v37 = vmax.f32 %v2724_v34, 0.0 }
0x1a15   :  { %2865 = vmatprep.mubr.f32.mxu0 %v2727_v44  ;;  %2935 = vmatprep.mubr.f32.mxu1 %v2729_v37 }
0x1a16   :  { %2866 = vmatmul.mubr.f32.vlgmr.msra.gmra.mrb[24].mxu0 %v2726_v38  ;;  %2936 = vmatmul.mubr.f32.vlgmr.msra.gmra.mrb[36].mxu1 %v2728_v36 }
0x1a17   :  { %3888 = vmatpush3.bf16.msra.mxu0 %v3887_v42  ;;  %3659 = vmatprep.mubr.msk.f32.mxu0 %vm4100_vm1, %v4101_v45 }
0x1a18   :  { %3889 = vmatprep.subr.bf16.mxu0 %v4099_v39 }
0x1a1b   :  { %3891 = vmatpush3.bf16.msra.mxu0 %v3890_v46 }
0x1a1c   :  { %3892 = vmatprep.subr.bf16.mxu0 %v4099_v39 }
0x1a1f   :  { %3894 = vmatpush3.bf16.msra.mxu0 %v3893_v50 }
0x1a20   :  { %3895 = vmatprep.subr.bf16.mxu0 %v4099_v39 }
0x1a23   :  { %3897 = vmatpush3.bf16.msra.mxu0 %v3896_v16 }
0x1a24   :  { %3898 = vmatprep.subr.bf16.mxu0 %v4099_v39 }
0x1a27   :  { %3900 = vmatpush3.bf16.msra.mxu0 %v3899_v17 }
0x1a28   :  { %3901 = vmatprep.subr.bf16.mxu0 %v4099_v39 }
0x1a2b   :  { %3903 = vmatpush3.bf16.msra.mxu0 %v3902_v18 }
0x1a2c   :  { %3904 = vmatprep.subr.bf16.mxu0 %v4099_v39 }
0x1a2f   :  { %3906 = vmatpush3.bf16.msra.mxu0 %v3905_v19 }
0x1a30   :  { %3907 = vmatprep.subr.bf16.mxu0 %v4099_v39 }
0x1a33   :  { %3909 = vmatpush3.bf16.msra.mxu0 %v3908_v20 }
0x1ae9   :  { %v3294_v21 = vpop.f32.mrb[24].mxu0  ;;  %v3329_v22 = vpop.f32.mrb[36].mxu1 }
0x1aea   :  { %v3295_v24 = vpop.f32.mrb[25].mxu0  ;;  %v3330_v25 = vpop.f32.mrb[37].mxu1 }
0x1aeb   :  { %v3296_v26 = vadd.f32 %v3295_v24, %v3294_v21  ;;  %v3331_v27 = vadd.f32 %v3330_v25, %v3329_v22 }
0x1aed   :  { %v2868_v45 = vadd.f32 %v3296_v26, %v3128_v23 }
0x1aef   :  { %v2938_v41 = vadd.f32 %v3331_v27, %v2868_v45 }
0x1af1   :  { %v2941_v28 = vmax.f32 %v2938_v41, 0.0 }
0x1af3   :  { %3660 = vmatmul.mubr.f32.vlgmr.msra.gmra.mrb[26].mxu0 %v2941_v28 }
0x1bc6   :  { %v3031_v30 = vpop.f32.mrb[26].mxu0 }
0x1bc7   :  { %v3032_v31 = vadd.f32 %v3129_v29, %v3031_v30  ;;  %v3661_v39 = vpop.f32.mrb[27].mxu0 }
0x1bc9   :  { %3036 = vst.msk [vmem:[%s4830_s13] sm:$0xff] %vm3035_vm3, %v3032_v31 }
0x1bca   :  { %3041 = vsyncpa [#allocation7], 1 }
0x1bcb   :  { %3042 = vsyncmov [#allocation5] }
0x1bce   :  { %s3043_s10 = vpop.sfrf %3042 }
0x1bcf   :  { %p3130_p2 = scmp.ne.s32.totalorder %s3043_s10, 0 }
0x1bd1   :  { %3047 = shalt.err (%p3130_p2)  }
0x1bd2   :  { %3049 = vsyncmov [#allocation5 + $0x1] }
0x1bd5   :  { %s3050_s25 = vpop.sfrf %3049 }
0x1bd6   :  { %p3131_p3 = scmp.ne.s32.totalorder %s3050_s25, 0 }
0x1bd8   :  { %3054 = shalt.err (%p3131_p3)  }
0x1bd9   :  { %3056 = vsyncmov [#allocation5 + $0x2] }
0x1bdc   :  { %s3057_s27 = vpop.sfrf %3056 }
0x1bdd   :  { %p3132_p4 = scmp.ne.s32.totalorder %s3057_s27, 0 }
0x1bdf   :  { %3061 = shalt.err (%p3132_p4)  }

</bundles_post_ra>
